<compile_context>
chip_gen: v7x
topology: tpu7x:2x2x1
jax: 0.10.0
libtpu: 0.0.40
codegen_flags: <defaults>
</compile_context>

<pallas_src>
import functools

import jax
import jax.numpy as jnp
from jax.experimental import pallas as pl
from jax.experimental.pallas import tpu as pltpu


def _mstcn_kernel(mask_ref, x_ref, w1_ref, b1_ref, wd_ref, bd_ref, wo_ref,
                  bo_ref, out_ref, *, num_stages, dilations):
    """One grid step == full multi-stage forward for one batch element.

    Per-step shapes (channel-major, T on lanes):
      mask_ref: (1, 1, T)        x_ref:  (1, Cin, T)
      w1_ref:   (S, Cf, Cin)     b1_ref: (S, Cf, 1)
      wd_ref:   (S, L, Cf, 3Cf)  bd_ref: (S, L, Cf, 1)   (BN already folded)
      wo_ref:   (S, Ncls, Cf)    bo_ref: (S, Ncls, 1)
      out_ref:  (S, 1, Ncls, T)
    """
    m = mask_ref[0].astype(jnp.float32)            # (1, T)
    x = x_ref[0].astype(jnp.float32)               # (Cin, T)
    T = x.shape[-1]

    for s in range(num_stages):
        if s > 0:
            # F.softmax(out, dim=1) * mask  (softmax over channels = sublanes)
            xmax = jnp.max(x, axis=0, keepdims=True)
            e = jnp.exp(x - xmax)
            inv = pl.reciprocal(jnp.sum(e, axis=0, keepdims=True), approx=True)
            x = (e * inv) * m

        # conv_1x1: pointwise conv == (Cf, Cin) @ (Cin, T); bf16 MXU, f32 acc.
        out = (jnp.dot(w1_ref[s], x.astype(jnp.bfloat16),
                       preferred_element_type=jnp.float32)
               + b1_ref[s])                         # (Cf, T) f32

        Cf = out.shape[0]
        col = jax.lax.broadcasted_iota(jnp.int32, (Cf, T), 1)

        for l, d in enumerate(dilations):
            # Shifted taps along time (lane axis): x[t-d], x[t+d], zero padded.
            x_prev = jnp.where(col >= d,
                               pltpu.roll(out, shift=d, axis=1), 0.0)
            x_next = jnp.where(col < T - d,
                               pltpu.roll(out, shift=(T - d) % T, axis=1), 0.0)
            # Single fused K=3*Cf matmul for the 3-tap dilated conv (BN folded
            # into the weights/bias at parameter-prep time).
            taps = jnp.concatenate([x_prev, out, x_next],
                                   axis=0).astype(jnp.bfloat16)   # (3Cf, T)
            y = (jnp.dot(wd_ref[s, l], taps,
                         preferred_element_type=jnp.float32)
                 + bd_ref[s, l])                    # (Cf, T)
            y = jnp.maximum(y, 0.0)                 # ReLU
            out = (out + y) * m                     # residual + mask

        # conv_out + mask; stored lane-dense as (Ncls, T).
        logits = (jnp.dot(wo_ref[s], out.astype(jnp.bfloat16),
                          preferred_element_type=jnp.float32)
                  + bo_ref[s]) * m                  # (Ncls, T)
        if s == 0:
            # extra mask multiply applied to stage_0 output in
            # MultiStageModel.forward (out = stage_0(x, mask) * mask[:,0:1,:])
            logits = logits * m
        out_ref[s, 0] = logits.astype(out_ref.dtype)
        x = logits                                   # feeds next stage


def multi_stage_forward(x_bct, mask_bct, params, dilations):
    """x_bct: (B, input_dim, T); mask_bct: (B, C, T) binary mask.

    Returns (num_stages, B, num_classes, T) -- same layout as PyTorch.
    """
    S, Cf, Cin = params["w1"].shape
    L = params["wd"].shape[1]
    Ncls = params["wo"].shape[1]
    B, Cin_x, T = x_bct.shape
    assert Cin_x == Cin
    assert L == len(dilations)
    if S > 1:
        assert Cin == Ncls, "MultiStageModel requires input_dim == num_classes"
    assert max(dilations) < T, "roll-based dilated conv needs max dilation < T"

    mask_b1t = mask_bct[:, 0:1, :].astype(jnp.float32)
    kernel = functools.partial(_mstcn_kernel, num_stages=S,
                               dilations=tuple(int(d) for d in dilations))

    def _const(shape):
        # Constant index_map: weights are DMA'd once (no per-step re-fetch).
        return pl.BlockSpec(shape, lambda b: (0,) * len(shape))

    return pl.pallas_call(
        kernel,
        out_shape=jax.ShapeDtypeStruct((S, B, Ncls, T), jnp.float32),
        grid=(B,),
        in_specs=[
            pl.BlockSpec((1, 1, T), lambda b: (b, 0, 0)),     # mask (B,1,T)
            pl.BlockSpec((1, Cin, T), lambda b: (b, 0, 0)),   # x    (B,Cin,T)
            _const((S, Cf, Cin)),        # conv_1x1 weights (bf16)
            _const((S, Cf, 1)),          # conv_1x1 bias (f32)
            _const((S, L, Cf, 3 * Cf)),  # fused dilated-conv weights (bf16, BN folded)
            _const((S, L, Cf, 1)),       # fused dilated-conv bias (f32, BN folded)
            _const((S, Ncls, Cf)),       # conv_out weights (bf16)
            _const((S, Ncls, 1)),        # conv_out bias (f32)
        ],
        out_specs=pl.BlockSpec((S, 1, Ncls, T), lambda b: (0, b, 0, 0)),
        compiler_params=pltpu.CompilerParams(
            dimension_semantics=("parallel",)),
    )(mask_b1t, x_bct, params["w1"], params["b1"], params["wd"],
      params["bd"], params["wo"], params["bo"])


# ---------------- parameter prep (PyTorch layout -> kernel layout) ----------

def init_stage_params_torch(key, input_dim, num_f_maps, num_classes,
                            num_layers):
    """Random parameters in PyTorch Conv1d / BatchNorm1d layout (f32)."""
    ks = jax.random.split(key, 10)
    s = 0.1
    n = jax.random.normal
    return dict(
        conv1x1_w=s * n(ks[0], (num_f_maps, input_dim, 1), jnp.float32),
        conv1x1_b=s * n(ks[1], (num_f_maps,), jnp.float32),
        convd_w=s * n(ks[2], (num_layers, num_f_maps, num_f_maps, 3),
                      jnp.float32),
        convd_b=s * n(ks[3], (num_layers, num_f_maps), jnp.float32),
        bn_gamma=1.0 + s * n(ks[4], (num_layers, num_f_maps), jnp.float32),
        bn_beta=s * n(ks[5], (num_layers, num_f_maps), jnp.float32),
        bn_mean=s * n(ks[6], (num_layers, num_f_maps), jnp.float32),
        bn_var=1.0 + 0.1 * jnp.abs(n(ks[7], (num_layers, num_f_maps),
                                     jnp.float32)),
        convout_w=s * n(ks[8], (num_classes, num_f_maps, 1), jnp.float32),
        convout_b=s * n(ks[9], (num_classes,), jnp.float32),
    )


def prepare_params(stage_params, eps=1e-5):
    """Fold eval-mode BN into the dilated convs, fuse the 3 taps into one
    (Cf, 3*Cf) matrix per layer, stack stages, cast matmul weights to bf16."""
    w1, b1, wd, bd, wo, bo = [], [], [], [], [], []
    for p in stage_params:
        w1.append(p["conv1x1_w"][:, :, 0])                        # (Cf, Cin)
        b1.append(p["conv1x1_b"][:, None])                        # (Cf, 1)
        scale = p["bn_gamma"] * jax.lax.rsqrt(p["bn_var"] + eps)  # (L, Cf)
        wk = p["convd_w"] * scale[:, :, None, None]               # (L,Cf,Cf,3)
        # tap order matches the kernel: [x[t-d] | x[t] | x[t+d]] == k = 0,1,2
        wd.append(jnp.concatenate([wk[..., 0], wk[..., 1], wk[..., 2]],
                                  axis=-1))                        # (L,Cf,3Cf)
        bd.append((scale * (p["convd_b"] - p["bn_mean"])
                   + p["bn_beta"])[..., None])                     # (L, Cf, 1)
        wo.append(p["convout_w"][:, :, 0])                         # (Ncls, Cf)
        bo.append(p["convout_b"][:, None])                         # (Ncls, 1)
    bf = lambda a: jnp.stack(a, 0).astype(jnp.bfloat16)
    f32 = lambda a: jnp.stack(a, 0).astype(jnp.float32)
    return dict(w1=bf(w1), b1=f32(b1), wd=bf(wd), bd=f32(bd),
                wo=bf(wo), bo=f32(bo))


# ---------------- pure-JAX reference (for correctness check) ----------------

def reference_forward(x, mask, stage_params, dilations, eps=1e-5):
    """f32 reference mirroring the PyTorch MultiStageModel (eval-mode BN)."""
    m = mask[:, 0:1, :]

    def conv1x1(h, w, b):  # w: (Co, Ci, 1)
        return jnp.einsum("oi,bit->bot", w[:, :, 0], h) + b[None, :, None]

    def stage(h, p):
        out = conv1x1(h, p["conv1x1_w"], p["conv1x1_b"])
        T = out.shape[-1]
        for l, d in enumerate(dilations):
            w = p["convd_w"][l]                    # (Co, Ci, 3)
            hp = jnp.pad(out, ((0, 0), (0, 0), (d, d)))
            y = (jnp.einsum("oi,bit->bot", w[:, :, 0], hp[:, :, 0:T])
                 + jnp.einsum("oi,bit->bot", w[:, :, 1], hp[:, :, d:d + T])
                 + jnp.einsum("oi,bit->bot", w[:, :, 2],
                              hp[:, :, 2 * d:2 * d + T])
                 + p["convd_b"][l][None, :, None])
            inv = jax.lax.rsqrt(p["bn_var"][l] + eps)
            y = ((y - p["bn_mean"][l][None, :, None]) * inv[None, :, None]
                 * p["bn_gamma"][l][None, :, None]
                 + p["bn_beta"][l][None, :, None])
            out = (out + jax.nn.relu(y)) * m
        return conv1x1(out, p["convout_w"], p["convout_b"]) * m

    out = stage(x, stage_params[0]) * m
    outs = [out]
    for p in stage_params[1:]:
        out = stage(jax.nn.softmax(out, axis=1) * m, p)
        outs.append(out)
    return jnp.stack(outs, axis=0)


if __name__ == "__main__":
    # Hyper-params (input_dim must equal num_classes, see NOTE above).
    num_stages = 3
    num_layers_per_stage = 4
    input_dim = 8
    num_classes = 8
    num_f_maps = 16
    dilations = [2 ** i for i in range(num_layers_per_stage)]  # [1, 2, 4, 8]

    B, T = 2, 128   # T multiple of 128 -> lane-dense stores & MXU N dim

    key = jax.random.PRNGKey(0)
    kx, kp = jax.random.split(key)
    x = jax.random.normal(kx, (B, input_dim, T), jnp.float32)

    # binary mask (B, num_classes, T): batch 0 fully valid, batch 1 length 100
    t_idx = jnp.arange(T)[None, None, :]
    lengths = jnp.array([T, 100], jnp.int32)[:, None, None]
    mask = (t_idx < lengths).astype(jnp.float32) * jnp.ones(
        (B, num_classes, T), jnp.float32)

    pkeys = jax.random.split(kp, num_stages)
    torch_params = [
        init_stage_params_torch(pkeys[si], input_dim, num_f_maps, num_classes,
                                num_layers_per_stage)
        for si in range(num_stages)
    ]
    params = prepare_params(torch_params)

    fwd = jax.jit(functools.partial(multi_stage_forward, dilations=dilations))
    out = jax.block_until_ready(fwd(x, mask, params))
    assert out.shape == (num_stages, B, num_classes, T), out.shape
    assert jnp.all(jnp.isfinite(out))

    # Correctness vs. pure-JAX f32 reference (bf16 MXU operands -> loose tol).
    ref = reference_forward(x, mask, torch_params, dilations)
    err = float(jnp.max(jnp.abs(out - ref)))
    assert err < 5e-2, f"max abs err vs reference: {err}"
    print("KERNEL_OK")
</pallas_src>

<mosaic_0001>
module attributes {stable_mosaic.version = 11 : i64} {
  func.func @_mstcn_kernel(%arg0: i32, %arg1: memref<1x1x128xf32, #tpu.memory_space<vmem>>, %arg2: memref<1x8x128xf32, #tpu.memory_space<vmem>>, %arg3: memref<3x16x8xbf16, #tpu.memory_space<vmem>>, %arg4: memref<3x16x1xf32, #tpu.memory_space<vmem>>, %arg5: memref<3x4x16x48xbf16, #tpu.memory_space<vmem>>, %arg6: memref<3x4x16x1xf32, #tpu.memory_space<vmem>>, %arg7: memref<3x8x16xbf16, #tpu.memory_space<vmem>>, %arg8: memref<3x8x1xf32, #tpu.memory_space<vmem>>, %arg9: memref<3x1x8x128xf32, #tpu.memory_space<vmem>>) attributes {dimension_semantics = [#tpu.dimension_semantics<parallel>], iteration_bounds = array<i64: 2>, scalar_prefetch = 0 : i64, scratch_operands = 0 : i64, tpu.core_type = #tpu.core_type<tc>, window_params = [{transform_indices = @transform_0, window_bounds = array<i64: 1, 1, 128>}, {transform_indices = @transform_1, window_bounds = array<i64: 1, 8, 128>}, {pipeline_mode = #tpu.pipeline_mode<synchronous>, transform_indices = @transform_2, window_bounds = array<i64: 3, 16, 8>}, {pipeline_mode = #tpu.pipeline_mode<synchronous>, transform_indices = @transform_3, window_bounds = array<i64: 3, 16, 1>}, {pipeline_mode = #tpu.pipeline_mode<synchronous>, transform_indices = @transform_4, window_bounds = array<i64: 3, 4, 16, 48>}, {pipeline_mode = #tpu.pipeline_mode<synchronous>, transform_indices = @transform_5, window_bounds = array<i64: 3, 4, 16, 1>}, {pipeline_mode = #tpu.pipeline_mode<synchronous>, transform_indices = @transform_6, window_bounds = array<i64: 3, 8, 16>}, {pipeline_mode = #tpu.pipeline_mode<synchronous>, transform_indices = @transform_7, window_bounds = array<i64: 3, 8, 1>}, {transform_indices = @transform_8, window_bounds = array<i64: 3, 1, 8, 128>}]} {
    %c0 = arith.constant 0 : index
    %c0_0 = arith.constant 0 : index
    %c0_1 = arith.constant 0 : index
    %0 = vector.load %arg1[%c0, %c0_0, %c0_1] : memref<1x1x128xf32, #tpu.memory_space<vmem>>, vector<1x1x128xf32>
    %1 = vector.shape_cast %0 : vector<1x1x128xf32> to vector<1x128xf32>
    %c0_2 = arith.constant 0 : index
    %c0_3 = arith.constant 0 : index
    %c0_4 = arith.constant 0 : index
    %2 = vector.load %arg2[%c0_2, %c0_3, %c0_4] : memref<1x8x128xf32, #tpu.memory_space<vmem>>, vector<1x8x128xf32>
    %3 = vector.shape_cast %2 : vector<1x8x128xf32> to vector<8x128xf32>
    %c0_5 = arith.constant 0 : index
    %c0_6 = arith.constant 0 : index
    %c0_7 = arith.constant 0 : index
    %4 = vector.load %arg3[%c0_5, %c0_6, %c0_7] : memref<3x16x8xbf16, #tpu.memory_space<vmem>>, vector<1x16x8xbf16>
    %5 = vector.shape_cast %4 : vector<1x16x8xbf16> to vector<16x8xbf16>
    %6 = arith.truncf %3 : vector<8x128xf32> to vector<8x128xbf16>
    %cst = arith.constant dense<0.000000e+00> : vector<16x128xf32>
    %7 = tpu.matmul %5, %6, %cst {dimension_numbers = #tpu.dot_dimension_numbers<[1], [0], [0], [1], [0, 0, 1, 1], [], []>} : vector<16x8xbf16>, vector<8x128xbf16>, vector<16x128xf32> -> vector<16x128xf32>
    %c0_8 = arith.constant 0 : index
    %c0_9 = arith.constant 0 : index
    %c0_10 = arith.constant 0 : index
    %8 = vector.load %arg4[%c0_8, %c0_9, %c0_10] : memref<3x16x1xf32, #tpu.memory_space<vmem>>, vector<1x16x1xf32>
    %9 = vector.shape_cast %8 : vector<1x16x1xf32> to vector<16x1xf32>
    %10 = vector.broadcast %9 : vector<16x1xf32> to vector<16x128xf32>
    %11 = arith.addf %7, %10 : vector<16x128xf32>
    %12 = tpu.iota {dimensions = array<i32: 1>} : vector<16x128xi32>
    %c1_i32 = arith.constant 1 : i32
    %13 = vector.broadcast %c1_i32 : i32 to vector<16x128xi32>
    %14 = arith.cmpi sge, %12, %13 : vector<16x128xi32>
    %c1_i32_11 = arith.constant 1 : i32
    %15 = tpu.dynamic_rotate %11 by %c1_i32_11 dim 1 : vector<16x128xf32>, i32 -> vector<16x128xf32>
    %cst_12 = arith.constant 0.000000e+00 : f32
    %16 = vector.broadcast %cst_12 : f32 to vector<16x128xf32>
    %17 = arith.select %14, %15, %16 : vector<16x128xi1>, vector<16x128xf32>
    %c127_i32 = arith.constant 127 : i32
    %18 = vector.broadcast %c127_i32 : i32 to vector<16x128xi32>
    %19 = arith.cmpi slt, %12, %18 : vector<16x128xi32>
    %c127_i32_13 = arith.constant 127 : i32
    %20 = tpu.dynamic_rotate %11 by %c127_i32_13 dim 1 : vector<16x128xf32>, i32 -> vector<16x128xf32>
    %cst_14 = arith.constant 0.000000e+00 : f32
    %21 = vector.broadcast %cst_14 : f32 to vector<16x128xf32>
    %22 = arith.select %19, %20, %21 : vector<16x128xi1>, vector<16x128xf32>
    %23 = tpu.concatenate %17, %11, %22 in 0 : vector<16x128xf32>, vector<16x128xf32>, vector<16x128xf32> -> vector<48x128xf32>
    %24 = arith.truncf %23 : vector<48x128xf32> to vector<48x128xbf16>
    %c0_15 = arith.constant 0 : index
    %c0_16 = arith.constant 0 : index
    %c0_17 = arith.constant 0 : index
    %c0_18 = arith.constant 0 : index
    %25 = vector.load %arg5[%c0_15, %c0_16, %c0_17, %c0_18] : memref<3x4x16x48xbf16, #tpu.memory_space<vmem>>, vector<1x1x16x48xbf16>
    %26 = vector.shape_cast %25 : vector<1x1x16x48xbf16> to vector<16x48xbf16>
    %cst_19 = arith.constant dense<0.000000e+00> : vector<16x128xf32>
    %27 = tpu.matmul %26, %24, %cst_19 {dimension_numbers = #tpu.dot_dimension_numbers<[1], [0], [0], [1], [0, 0, 1, 1], [], []>} : vector<16x48xbf16>, vector<48x128xbf16>, vector<16x128xf32> -> vector<16x128xf32>
    %c0_20 = arith.constant 0 : index
    %c0_21 = arith.constant 0 : index
    %c0_22 = arith.constant 0 : index
    %c0_23 = arith.constant 0 : index
    %28 = vector.load %arg6[%c0_20, %c0_21, %c0_22, %c0_23] : memref<3x4x16x1xf32, #tpu.memory_space<vmem>>, vector<1x1x16x1xf32>
    %29 = vector.shape_cast %28 : vector<1x1x16x1xf32> to vector<16x1xf32>
    %30 = vector.broadcast %29 : vector<16x1xf32> to vector<16x128xf32>
    %31 = arith.addf %27, %30 : vector<16x128xf32>
    %cst_24 = arith.constant 0.000000e+00 : f32
    %32 = vector.broadcast %cst_24 : f32 to vector<16x128xf32>
    %33 = arith.maximumf %31, %32 : vector<16x128xf32>
    %34 = arith.addf %11, %33 : vector<16x128xf32>
    %35 = vector.broadcast %1 : vector<1x128xf32> to vector<16x128xf32>
    %36 = arith.mulf %34, %35 : vector<16x128xf32>
    %c2_i32 = arith.constant 2 : i32
    %37 = vector.broadcast %c2_i32 : i32 to vector<16x128xi32>
    %38 = arith.cmpi sge, %12, %37 : vector<16x128xi32>
    %c2_i32_25 = arith.constant 2 : i32
    %39 = tpu.dynamic_rotate %36 by %c2_i32_25 dim 1 : vector<16x128xf32>, i32 -> vector<16x128xf32>
    %cst_26 = arith.constant 0.000000e+00 : f32
    %40 = vector.broadcast %cst_26 : f32 to vector<16x128xf32>
    %41 = arith.select %38, %39, %40 : vector<16x128xi1>, vector<16x128xf32>
    %c126_i32 = arith.constant 126 : i32
    %42 = vector.broadcast %c126_i32 : i32 to vector<16x128xi32>
    %43 = arith.cmpi slt, %12, %42 : vector<16x128xi32>
    %c126_i32_27 = arith.constant 126 : i32
    %44 = tpu.dynamic_rotate %36 by %c126_i32_27 dim 1 : vector<16x128xf32>, i32 -> vector<16x128xf32>
    %cst_28 = arith.constant 0.000000e+00 : f32
    %45 = vector.broadcast %cst_28 : f32 to vector<16x128xf32>
    %46 = arith.select %43, %44, %45 : vector<16x128xi1>, vector<16x128xf32>
    %47 = tpu.concatenate %41, %36, %46 in 0 : vector<16x128xf32>, vector<16x128xf32>, vector<16x128xf32> -> vector<48x128xf32>
    %48 = arith.truncf %47 : vector<48x128xf32> to vector<48x128xbf16>
    %c0_29 = arith.constant 0 : index
    %c1 = arith.constant 1 : index
    %c0_30 = arith.constant 0 : index
    %c0_31 = arith.constant 0 : index
    %49 = vector.load %arg5[%c0_29, %c1, %c0_30, %c0_31] : memref<3x4x16x48xbf16, #tpu.memory_space<vmem>>, vector<1x1x16x48xbf16>
    %50 = vector.shape_cast %49 : vector<1x1x16x48xbf16> to vector<16x48xbf16>
    %cst_32 = arith.constant dense<0.000000e+00> : vector<16x128xf32>
    %51 = tpu.matmul %50, %48, %cst_32 {dimension_numbers = #tpu.dot_dimension_numbers<[1], [0], [0], [1], [0, 0, 1, 1], [], []>} : vector<16x48xbf16>, vector<48x128xbf16>, vector<16x128xf32> -> vector<16x128xf32>
    %c0_33 = arith.constant 0 : index
    %c1_34 = arith.constant 1 : index
    %c0_35 = arith.constant 0 : index
    %c0_36 = arith.constant 0 : index
    %52 = vector.load %arg6[%c0_33, %c1_34, %c0_35, %c0_36] : memref<3x4x16x1xf32, #tpu.memory_space<vmem>>, vector<1x1x16x1xf32>
    %53 = vector.shape_cast %52 : vector<1x1x16x1xf32> to vector<16x1xf32>
    %54 = vector.broadcast %53 : vector<16x1xf32> to vector<16x128xf32>
    %55 = arith.addf %51, %54 : vector<16x128xf32>
    %cst_37 = arith.constant 0.000000e+00 : f32
    %56 = vector.broadcast %cst_37 : f32 to vector<16x128xf32>
    %57 = arith.maximumf %55, %56 : vector<16x128xf32>
    %58 = arith.addf %36, %57 : vector<16x128xf32>
    %59 = vector.broadcast %1 : vector<1x128xf32> to vector<16x128xf32>
    %60 = arith.mulf %58, %59 : vector<16x128xf32>
    %c4_i32 = arith.constant 4 : i32
    %61 = vector.broadcast %c4_i32 : i32 to vector<16x128xi32>
    %62 = arith.cmpi sge, %12, %61 : vector<16x128xi32>
    %c4_i32_38 = arith.constant 4 : i32
    %63 = tpu.dynamic_rotate %60 by %c4_i32_38 dim 1 : vector<16x128xf32>, i32 -> vector<16x128xf32>
    %cst_39 = arith.constant 0.000000e+00 : f32
    %64 = vector.broadcast %cst_39 : f32 to vector<16x128xf32>
    %65 = arith.select %62, %63, %64 : vector<16x128xi1>, vector<16x128xf32>
    %c124_i32 = arith.constant 124 : i32
    %66 = vector.broadcast %c124_i32 : i32 to vector<16x128xi32>
    %67 = arith.cmpi slt, %12, %66 : vector<16x128xi32>
    %c124_i32_40 = arith.constant 124 : i32
    %68 = tpu.dynamic_rotate %60 by %c124_i32_40 dim 1 : vector<16x128xf32>, i32 -> vector<16x128xf32>
    %cst_41 = arith.constant 0.000000e+00 : f32
    %69 = vector.broadcast %cst_41 : f32 to vector<16x128xf32>
    %70 = arith.select %67, %68, %69 : vector<16x128xi1>, vector<16x128xf32>
    %71 = tpu.concatenate %65, %60, %70 in 0 : vector<16x128xf32>, vector<16x128xf32>, vector<16x128xf32> -> vector<48x128xf32>
    %72 = arith.truncf %71 : vector<48x128xf32> to vector<48x128xbf16>
    %c0_42 = arith.constant 0 : index
    %c2 = arith.constant 2 : index
    %c0_43 = arith.constant 0 : index
    %c0_44 = arith.constant 0 : index
    %73 = vector.load %arg5[%c0_42, %c2, %c0_43, %c0_44] : memref<3x4x16x48xbf16, #tpu.memory_space<vmem>>, vector<1x1x16x48xbf16>
    %74 = vector.shape_cast %73 : vector<1x1x16x48xbf16> to vector<16x48xbf16>
    %cst_45 = arith.constant dense<0.000000e+00> : vector<16x128xf32>
    %75 = tpu.matmul %74, %72, %cst_45 {dimension_numbers = #tpu.dot_dimension_numbers<[1], [0], [0], [1], [0, 0, 1, 1], [], []>} : vector<16x48xbf16>, vector<48x128xbf16>, vector<16x128xf32> -> vector<16x128xf32>
    %c0_46 = arith.constant 0 : index
    %c2_47 = arith.constant 2 : index
    %c0_48 = arith.constant 0 : index
    %c0_49 = arith.constant 0 : index
    %76 = vector.load %arg6[%c0_46, %c2_47, %c0_48, %c0_49] : memref<3x4x16x1xf32, #tpu.memory_space<vmem>>, vector<1x1x16x1xf32>
    %77 = vector.shape_cast %76 : vector<1x1x16x1xf32> to vector<16x1xf32>
    %78 = vector.broadcast %77 : vector<16x1xf32> to vector<16x128xf32>
    %79 = arith.addf %75, %78 : vector<16x128xf32>
    %cst_50 = arith.constant 0.000000e+00 : f32
    %80 = vector.broadcast %cst_50 : f32 to vector<16x128xf32>
    %81 = arith.maximumf %79, %80 : vector<16x128xf32>
    %82 = arith.addf %60, %81 : vector<16x128xf32>
    %83 = vector.broadcast %1 : vector<1x128xf32> to vector<16x128xf32>
    %84 = arith.mulf %82, %83 : vector<16x128xf32>
    %c8_i32 = arith.constant 8 : i32
    %85 = vector.broadcast %c8_i32 : i32 to vector<16x128xi32>
    %86 = arith.cmpi sge, %12, %85 : vector<16x128xi32>
    %c8_i32_51 = arith.constant 8 : i32
    %87 = tpu.dynamic_rotate %84 by %c8_i32_51 dim 1 : vector<16x128xf32>, i32 -> vector<16x128xf32>
    %cst_52 = arith.constant 0.000000e+00 : f32
    %88 = vector.broadcast %cst_52 : f32 to vector<16x128xf32>
    %89 = arith.select %86, %87, %88 : vector<16x128xi1>, vector<16x128xf32>
    %c120_i32 = arith.constant 120 : i32
    %90 = vector.broadcast %c120_i32 : i32 to vector<16x128xi32>
    %91 = arith.cmpi slt, %12, %90 : vector<16x128xi32>
    %c120_i32_53 = arith.constant 120 : i32
    %92 = tpu.dynamic_rotate %84 by %c120_i32_53 dim 1 : vector<16x128xf32>, i32 -> vector<16x128xf32>
    %cst_54 = arith.constant 0.000000e+00 : f32
    %93 = vector.broadcast %cst_54 : f32 to vector<16x128xf32>
    %94 = arith.select %91, %92, %93 : vector<16x128xi1>, vector<16x128xf32>
    %95 = tpu.concatenate %89, %84, %94 in 0 : vector<16x128xf32>, vector<16x128xf32>, vector<16x128xf32> -> vector<48x128xf32>
    %96 = arith.truncf %95 : vector<48x128xf32> to vector<48x128xbf16>
    %c0_55 = arith.constant 0 : index
    %c3 = arith.constant 3 : index
    %c0_56 = arith.constant 0 : index
    %c0_57 = arith.constant 0 : index
    %97 = vector.load %arg5[%c0_55, %c3, %c0_56, %c0_57] : memref<3x4x16x48xbf16, #tpu.memory_space<vmem>>, vector<1x1x16x48xbf16>
    %98 = vector.shape_cast %97 : vector<1x1x16x48xbf16> to vector<16x48xbf16>
    %cst_58 = arith.constant dense<0.000000e+00> : vector<16x128xf32>
    %99 = tpu.matmul %98, %96, %cst_58 {dimension_numbers = #tpu.dot_dimension_numbers<[1], [0], [0], [1], [0, 0, 1, 1], [], []>} : vector<16x48xbf16>, vector<48x128xbf16>, vector<16x128xf32> -> vector<16x128xf32>
    %c0_59 = arith.constant 0 : index
    %c3_60 = arith.constant 3 : index
    %c0_61 = arith.constant 0 : index
    %c0_62 = arith.constant 0 : index
    %100 = vector.load %arg6[%c0_59, %c3_60, %c0_61, %c0_62] : memref<3x4x16x1xf32, #tpu.memory_space<vmem>>, vector<1x1x16x1xf32>
    %101 = vector.shape_cast %100 : vector<1x1x16x1xf32> to vector<16x1xf32>
    %102 = vector.broadcast %101 : vector<16x1xf32> to vector<16x128xf32>
    %103 = arith.addf %99, %102 : vector<16x128xf32>
    %cst_63 = arith.constant 0.000000e+00 : f32
    %104 = vector.broadcast %cst_63 : f32 to vector<16x128xf32>
    %105 = arith.maximumf %103, %104 : vector<16x128xf32>
    %106 = arith.addf %84, %105 : vector<16x128xf32>
    %107 = vector.broadcast %1 : vector<1x128xf32> to vector<16x128xf32>
    %108 = arith.mulf %106, %107 : vector<16x128xf32>
    %c0_64 = arith.constant 0 : index
    %c0_65 = arith.constant 0 : index
    %c0_66 = arith.constant 0 : index
    %109 = vector.load %arg7[%c0_64, %c0_65, %c0_66] : memref<3x8x16xbf16, #tpu.memory_space<vmem>>, vector<1x8x16xbf16>
    %110 = vector.shape_cast %109 : vector<1x8x16xbf16> to vector<8x16xbf16>
    %111 = arith.truncf %108 : vector<16x128xf32> to vector<16x128xbf16>
    %cst_67 = arith.constant dense<0.000000e+00> : vector<8x128xf32>
    %112 = tpu.matmul %110, %111, %cst_67 {dimension_numbers = #tpu.dot_dimension_numbers<[1], [0], [0], [1], [0, 0, 1, 1], [], []>} : vector<8x16xbf16>, vector<16x128xbf16>, vector<8x128xf32> -> vector<8x128xf32>
    %c0_68 = arith.constant 0 : index
    %c0_69 = arith.constant 0 : index
    %c0_70 = arith.constant 0 : index
    %113 = vector.load %arg8[%c0_68, %c0_69, %c0_70] : memref<3x8x1xf32, #tpu.memory_space<vmem>>, vector<1x8x1xf32>
    %114 = vector.shape_cast %113 : vector<1x8x1xf32> to vector<8x1xf32>
    %115 = vector.broadcast %114 : vector<8x1xf32> to vector<8x128xf32>
    %116 = arith.addf %112, %115 : vector<8x128xf32>
    %117 = vector.broadcast %1 : vector<1x128xf32> to vector<8x128xf32>
    %118 = arith.mulf %116, %117 : vector<8x128xf32>
    %119 = vector.broadcast %1 : vector<1x128xf32> to vector<8x128xf32>
    %120 = arith.mulf %118, %119 : vector<8x128xf32>
    %c0_71 = arith.constant 0 : index
    %c0_72 = arith.constant 0 : index
    %c0_73 = arith.constant 0 : index
    %c0_74 = arith.constant 0 : index
    %121 = vector.load %arg9[%c0_71, %c0_72, %c0_73, %c0_74] : memref<3x1x8x128xf32, #tpu.memory_space<vmem>>, vector<1x1x8x128xf32>
    %122 = vector.shape_cast %121 : vector<1x1x8x128xf32> to vector<8x128xf32>
    %123 = vector.shape_cast %120 : vector<8x128xf32> to vector<1x1x8x128xf32>
    tpu.vector_store %arg9[%c0_71, %c0_72, %c0_73, %c0_74], %123 {strides = array<i32>} : memref<3x1x8x128xf32, #tpu.memory_space<vmem>>, vector<1x1x8x128xf32>,
    %cst_75 = arith.constant dense<0xFF800000> : vector<128xf32>
    %124 = vector.multi_reduction <maximumf>, %120, %cst_75 [0] : vector<8x128xf32> to vector<128xf32>
    %125 = vector.shape_cast %124 : vector<128xf32> to vector<1x128xf32>
    %126 = vector.broadcast %125 : vector<1x128xf32> to vector<8x128xf32>
    %127 = arith.subf %120, %126 : vector<8x128xf32>
    %128 = math.exp %127 : vector<8x128xf32>
    %cst_76 = arith.constant dense<0.000000e+00> : vector<128xf32>
    %129 = vector.multi_reduction <add>, %128, %cst_76 [0] : vector<8x128xf32> to vector<128xf32>
    %130 = vector.shape_cast %129 : vector<128xf32> to vector<1x128xf32>
    %131 = tpu.reciprocal %130 {approx = true} : vector<1x128xf32> -> vector<1x128xf32>
    %132 = vector.broadcast %131 : vector<1x128xf32> to vector<8x128xf32>
    %133 = arith.mulf %128, %132 : vector<8x128xf32>
    %134 = vector.broadcast %1 : vector<1x128xf32> to vector<8x128xf32>
    %135 = arith.mulf %133, %134 : vector<8x128xf32>
    %c1_77 = arith.constant 1 : index
    %c0_78 = arith.constant 0 : index
    %c0_79 = arith.constant 0 : index
    %136 = vector.load %arg3[%c1_77, %c0_78, %c0_79] : memref<3x16x8xbf16, #tpu.memory_space<vmem>>, vector<1x16x8xbf16>
    %137 = vector.shape_cast %136 : vector<1x16x8xbf16> to vector<16x8xbf16>
    %138 = arith.truncf %135 : vector<8x128xf32> to vector<8x128xbf16>
    %cst_80 = arith.constant dense<0.000000e+00> : vector<16x128xf32>
    %139 = tpu.matmul %137, %138, %cst_80 {dimension_numbers = #tpu.dot_dimension_numbers<[1], [0], [0], [1], [0, 0, 1, 1], [], []>} : vector<16x8xbf16>, vector<8x128xbf16>, vector<16x128xf32> -> vector<16x128xf32>
    %c1_81 = arith.constant 1 : index
    %c0_82 = arith.constant 0 : index
    %c0_83 = arith.constant 0 : index
    %140 = vector.load %arg4[%c1_81, %c0_82, %c0_83] : memref<3x16x1xf32, #tpu.memory_space<vmem>>, vector<1x16x1xf32>
    %141 = vector.shape_cast %140 : vector<1x16x1xf32> to vector<16x1xf32>
    %142 = vector.broadcast %141 : vector<16x1xf32> to vector<16x128xf32>
    %143 = arith.addf %139, %142 : vector<16x128xf32>
    %144 = tpu.iota {dimensions = array<i32: 1>} : vector<16x128xi32>
    %c1_i32_84 = arith.constant 1 : i32
    %145 = vector.broadcast %c1_i32_84 : i32 to vector<16x128xi32>
    %146 = arith.cmpi sge, %144, %145 : vector<16x128xi32>
    %c1_i32_85 = arith.constant 1 : i32
    %147 = tpu.dynamic_rotate %143 by %c1_i32_85 dim 1 : vector<16x128xf32>, i32 -> vector<16x128xf32>
    %cst_86 = arith.constant 0.000000e+00 : f32
    %148 = vector.broadcast %cst_86 : f32 to vector<16x128xf32>
    %149 = arith.select %146, %147, %148 : vector<16x128xi1>, vector<16x128xf32>
    %c127_i32_87 = arith.constant 127 : i32
    %150 = vector.broadcast %c127_i32_87 : i32 to vector<16x128xi32>
    %151 = arith.cmpi slt, %144, %150 : vector<16x128xi32>
    %c127_i32_88 = arith.constant 127 : i32
    %152 = tpu.dynamic_rotate %143 by %c127_i32_88 dim 1 : vector<16x128xf32>, i32 -> vector<16x128xf32>
    %cst_89 = arith.constant 0.000000e+00 : f32
    %153 = vector.broadcast %cst_89 : f32 to vector<16x128xf32>
    %154 = arith.select %151, %152, %153 : vector<16x128xi1>, vector<16x128xf32>
    %155 = tpu.concatenate %149, %143, %154 in 0 : vector<16x128xf32>, vector<16x128xf32>, vector<16x128xf32> -> vector<48x128xf32>
    %156 = arith.truncf %155 : vector<48x128xf32> to vector<48x128xbf16>
    %c1_90 = arith.constant 1 : index
    %c0_91 = arith.constant 0 : index
    %c0_92 = arith.constant 0 : index
    %c0_93 = arith.constant 0 : index
    %157 = vector.load %arg5[%c1_90, %c0_91, %c0_92, %c0_93] : memref<3x4x16x48xbf16, #tpu.memory_space<vmem>>, vector<1x1x16x48xbf16>
    %158 = vector.shape_cast %157 : vector<1x1x16x48xbf16> to vector<16x48xbf16>
    %cst_94 = arith.constant dense<0.000000e+00> : vector<16x128xf32>
    %159 = tpu.matmul %158, %156, %cst_94 {dimension_numbers = #tpu.dot_dimension_numbers<[1], [0], [0], [1], [0, 0, 1, 1], [], []>} : vector<16x48xbf16>, vector<48x128xbf16>, vector<16x128xf32> -> vector<16x128xf32>
    %c1_95 = arith.constant 1 : index
    %c0_96 = arith.constant 0 : index
    %c0_97 = arith.constant 0 : index
    %c0_98 = arith.constant 0 : index
    %160 = vector.load %arg6[%c1_95, %c0_96, %c0_97, %c0_98] : memref<3x4x16x1xf32, #tpu.memory_space<vmem>>, vector<1x1x16x1xf32>
    %161 = vector.shape_cast %160 : vector<1x1x16x1xf32> to vector<16x1xf32>
    %162 = vector.broadcast %161 : vector<16x1xf32> to vector<16x128xf32>
    %163 = arith.addf %159, %162 : vector<16x128xf32>
    %cst_99 = arith.constant 0.000000e+00 : f32
    %164 = vector.broadcast %cst_99 : f32 to vector<16x128xf32>
    %165 = arith.maximumf %163, %164 : vector<16x128xf32>
    %166 = arith.addf %143, %165 : vector<16x128xf32>
    %167 = vector.broadcast %1 : vector<1x128xf32> to vector<16x128xf32>
    %168 = arith.mulf %166, %167 : vector<16x128xf32>
    %c2_i32_100 = arith.constant 2 : i32
    %169 = vector.broadcast %c2_i32_100 : i32 to vector<16x128xi32>
    %170 = arith.cmpi sge, %144, %169 : vector<16x128xi32>
    %c2_i32_101 = arith.constant 2 : i32
    %171 = tpu.dynamic_rotate %168 by %c2_i32_101 dim 1 : vector<16x128xf32>, i32 -> vector<16x128xf32>
    %cst_102 = arith.constant 0.000000e+00 : f32
    %172 = vector.broadcast %cst_102 : f32 to vector<16x128xf32>
    %173 = arith.select %170, %171, %172 : vector<16x128xi1>, vector<16x128xf32>
    %c126_i32_103 = arith.constant 126 : i32
    %174 = vector.broadcast %c126_i32_103 : i32 to vector<16x128xi32>
    %175 = arith.cmpi slt, %144, %174 : vector<16x128xi32>
    %c126_i32_104 = arith.constant 126 : i32
    %176 = tpu.dynamic_rotate %168 by %c126_i32_104 dim 1 : vector<16x128xf32>, i32 -> vector<16x128xf32>
    %cst_105 = arith.constant 0.000000e+00 : f32
    %177 = vector.broadcast %cst_105 : f32 to vector<16x128xf32>
    %178 = arith.select %175, %176, %177 : vector<16x128xi1>, vector<16x128xf32>
    %179 = tpu.concatenate %173, %168, %178 in 0 : vector<16x128xf32>, vector<16x128xf32>, vector<16x128xf32> -> vector<48x128xf32>
    %180 = arith.truncf %179 : vector<48x128xf32> to vector<48x128xbf16>
    %c1_106 = arith.constant 1 : index
    %c1_107 = arith.constant 1 : index
    %c0_108 = arith.constant 0 : index
    %c0_109 = arith.constant 0 : index
    %181 = vector.load %arg5[%c1_106, %c1_107, %c0_108, %c0_109] : memref<3x4x16x48xbf16, #tpu.memory_space<vmem>>, vector<1x1x16x48xbf16>
    %182 = vector.shape_cast %181 : vector<1x1x16x48xbf16> to vector<16x48xbf16>
    %cst_110 = arith.constant dense<0.000000e+00> : vector<16x128xf32>
    %183 = tpu.matmul %182, %180, %cst_110 {dimension_numbers = #tpu.dot_dimension_numbers<[1], [0], [0], [1], [0, 0, 1, 1], [], []>} : vector<16x48xbf16>, vector<48x128xbf16>, vector<16x128xf32> -> vector<16x128xf32>
    %c1_111 = arith.constant 1 : index
    %c1_112 = arith.constant 1 : index
    %c0_113 = arith.constant 0 : index
    %c0_114 = arith.constant 0 : index
    %184 = vector.load %arg6[%c1_111, %c1_112, %c0_113, %c0_114] : memref<3x4x16x1xf32, #tpu.memory_space<vmem>>, vector<1x1x16x1xf32>
    %185 = vector.shape_cast %184 : vector<1x1x16x1xf32> to vector<16x1xf32>
    %186 = vector.broadcast %185 : vector<16x1xf32> to vector<16x128xf32>
    %187 = arith.addf %183, %186 : vector<16x128xf32>
    %cst_115 = arith.constant 0.000000e+00 : f32
    %188 = vector.broadcast %cst_115 : f32 to vector<16x128xf32>
    %189 = arith.maximumf %187, %188 : vector<16x128xf32>
    %190 = arith.addf %168, %189 : vector<16x128xf32>
    %191 = vector.broadcast %1 : vector<1x128xf32> to vector<16x128xf32>
    %192 = arith.mulf %190, %191 : vector<16x128xf32>
    %c4_i32_116 = arith.constant 4 : i32
    %193 = vector.broadcast %c4_i32_116 : i32 to vector<16x128xi32>
    %194 = arith.cmpi sge, %144, %193 : vector<16x128xi32>
    %c4_i32_117 = arith.constant 4 : i32
    %195 = tpu.dynamic_rotate %192 by %c4_i32_117 dim 1 : vector<16x128xf32>, i32 -> vector<16x128xf32>
    %cst_118 = arith.constant 0.000000e+00 : f32
    %196 = vector.broadcast %cst_118 : f32 to vector<16x128xf32>
    %197 = arith.select %194, %195, %196 : vector<16x128xi1>, vector<16x128xf32>
    %c124_i32_119 = arith.constant 124 : i32
    %198 = vector.broadcast %c124_i32_119 : i32 to vector<16x128xi32>
    %199 = arith.cmpi slt, %144, %198 : vector<16x128xi32>
    %c124_i32_120 = arith.constant 124 : i32
    %200 = tpu.dynamic_rotate %192 by %c124_i32_120 dim 1 : vector<16x128xf32>, i32 -> vector<16x128xf32>
    %cst_121 = arith.constant 0.000000e+00 : f32
    %201 = vector.broadcast %cst_121 : f32 to vector<16x128xf32>
    %202 = arith.select %199, %200, %201 : vector<16x128xi1>, vector<16x128xf32>
    %203 = tpu.concatenate %197, %192, %202 in 0 : vector<16x128xf32>, vector<16x128xf32>, vector<16x128xf32> -> vector<48x128xf32>
    %204 = arith.truncf %203 : vector<48x128xf32> to vector<48x128xbf16>
    %c1_122 = arith.constant 1 : index
    %c2_123 = arith.constant 2 : index
    %c0_124 = arith.constant 0 : index
    %c0_125 = arith.constant 0 : index
    %205 = vector.load %arg5[%c1_122, %c2_123, %c0_124, %c0_125] : memref<3x4x16x48xbf16, #tpu.memory_space<vmem>>, vector<1x1x16x48xbf16>
    %206 = vector.shape_cast %205 : vector<1x1x16x48xbf16> to vector<16x48xbf16>
    %cst_126 = arith.constant dense<0.000000e+00> : vector<16x128xf32>
    %207 = tpu.matmul %206, %204, %cst_126 {dimension_numbers = #tpu.dot_dimension_numbers<[1], [0], [0], [1], [0, 0, 1, 1], [], []>} : vector<16x48xbf16>, vector<48x128xbf16>, vector<16x128xf32> -> vector<16x128xf32>
    %c1_127 = arith.constant 1 : index
    %c2_128 = arith.constant 2 : index
    %c0_129 = arith.constant 0 : index
    %c0_130 = arith.constant 0 : index
    %208 = vector.load %arg6[%c1_127, %c2_128, %c0_129, %c0_130] : memref<3x4x16x1xf32, #tpu.memory_space<vmem>>, vector<1x1x16x1xf32>
    %209 = vector.shape_cast %208 : vector<1x1x16x1xf32> to vector<16x1xf32>
    %210 = vector.broadcast %209 : vector<16x1xf32> to vector<16x128xf32>
    %211 = arith.addf %207, %210 : vector<16x128xf32>
    %cst_131 = arith.constant 0.000000e+00 : f32
    %212 = vector.broadcast %cst_131 : f32 to vector<16x128xf32>
    %213 = arith.maximumf %211, %212 : vector<16x128xf32>
    %214 = arith.addf %192, %213 : vector<16x128xf32>
    %215 = vector.broadcast %1 : vector<1x128xf32> to vector<16x128xf32>
    %216 = arith.mulf %214, %215 : vector<16x128xf32>
    %c8_i32_132 = arith.constant 8 : i32
    %217 = vector.broadcast %c8_i32_132 : i32 to vector<16x128xi32>
    %218 = arith.cmpi sge, %144, %217 : vector<16x128xi32>
    %c8_i32_133 = arith.constant 8 : i32
    %219 = tpu.dynamic_rotate %216 by %c8_i32_133 dim 1 : vector<16x128xf32>, i32 -> vector<16x128xf32>
    %cst_134 = arith.constant 0.000000e+00 : f32
    %220 = vector.broadcast %cst_134 : f32 to vector<16x128xf32>
    %221 = arith.select %218, %219, %220 : vector<16x128xi1>, vector<16x128xf32>
    %c120_i32_135 = arith.constant 120 : i32
    %222 = vector.broadcast %c120_i32_135 : i32 to vector<16x128xi32>
    %223 = arith.cmpi slt, %144, %222 : vector<16x128xi32>
    %c120_i32_136 = arith.constant 120 : i32
    %224 = tpu.dynamic_rotate %216 by %c120_i32_136 dim 1 : vector<16x128xf32>, i32 -> vector<16x128xf32>
    %cst_137 = arith.constant 0.000000e+00 : f32
    %225 = vector.broadcast %cst_137 : f32 to vector<16x128xf32>
    %226 = arith.select %223, %224, %225 : vector<16x128xi1>, vector<16x128xf32>
    %227 = tpu.concatenate %221, %216, %226 in 0 : vector<16x128xf32>, vector<16x128xf32>, vector<16x128xf32> -> vector<48x128xf32>
    %228 = arith.truncf %227 : vector<48x128xf32> to vector<48x128xbf16>
    %c1_138 = arith.constant 1 : index
    %c3_139 = arith.constant 3 : index
    %c0_140 = arith.constant 0 : index
    %c0_141 = arith.constant 0 : index
    %229 = vector.load %arg5[%c1_138, %c3_139, %c0_140, %c0_141] : memref<3x4x16x48xbf16, #tpu.memory_space<vmem>>, vector<1x1x16x48xbf16>
    %230 = vector.shape_cast %229 : vector<1x1x16x48xbf16> to vector<16x48xbf16>
    %cst_142 = arith.constant dense<0.000000e+00> : vector<16x128xf32>
    %231 = tpu.matmul %230, %228, %cst_142 {dimension_numbers = #tpu.dot_dimension_numbers<[1], [0], [0], [1], [0, 0, 1, 1], [], []>} : vector<16x48xbf16>, vector<48x128xbf16>, vector<16x128xf32> -> vector<16x128xf32>
    %c1_143 = arith.constant 1 : index
    %c3_144 = arith.constant 3 : index
    %c0_145 = arith.constant 0 : index
    %c0_146 = arith.constant 0 : index
    %232 = vector.load %arg6[%c1_143, %c3_144, %c0_145, %c0_146] : memref<3x4x16x1xf32, #tpu.memory_space<vmem>>, vector<1x1x16x1xf32>
    %233 = vector.shape_cast %232 : vector<1x1x16x1xf32> to vector<16x1xf32>
    %234 = vector.broadcast %233 : vector<16x1xf32> to vector<16x128xf32>
    %235 = arith.addf %231, %234 : vector<16x128xf32>
    %cst_147 = arith.constant 0.000000e+00 : f32
    %236 = vector.broadcast %cst_147 : f32 to vector<16x128xf32>
    %237 = arith.maximumf %235, %236 : vector<16x128xf32>
    %238 = arith.addf %216, %237 : vector<16x128xf32>
    %239 = vector.broadcast %1 : vector<1x128xf32> to vector<16x128xf32>
    %240 = arith.mulf %238, %239 : vector<16x128xf32>
    %c1_148 = arith.constant 1 : index
    %c0_149 = arith.constant 0 : index
    %c0_150 = arith.constant 0 : index
    %241 = vector.load %arg7[%c1_148, %c0_149, %c0_150] : memref<3x8x16xbf16, #tpu.memory_space<vmem>>, vector<1x8x16xbf16>
    %242 = vector.shape_cast %241 : vector<1x8x16xbf16> to vector<8x16xbf16>
    %243 = arith.truncf %240 : vector<16x128xf32> to vector<16x128xbf16>
    %cst_151 = arith.constant dense<0.000000e+00> : vector<8x128xf32>
    %244 = tpu.matmul %242, %243, %cst_151 {dimension_numbers = #tpu.dot_dimension_numbers<[1], [0], [0], [1], [0, 0, 1, 1], [], []>} : vector<8x16xbf16>, vector<16x128xbf16>, vector<8x128xf32> -> vector<8x128xf32>
    %c1_152 = arith.constant 1 : index
    %c0_153 = arith.constant 0 : index
    %c0_154 = arith.constant 0 : index
    %245 = vector.load %arg8[%c1_152, %c0_153, %c0_154] : memref<3x8x1xf32, #tpu.memory_space<vmem>>, vector<1x8x1xf32>
    %246 = vector.shape_cast %245 : vector<1x8x1xf32> to vector<8x1xf32>
    %247 = vector.broadcast %246 : vector<8x1xf32> to vector<8x128xf32>
    %248 = arith.addf %244, %247 : vector<8x128xf32>
    %249 = vector.broadcast %1 : vector<1x128xf32> to vector<8x128xf32>
    %250 = arith.mulf %248, %249 : vector<8x128xf32>
    %c1_155 = arith.constant 1 : index
    %c0_156 = arith.constant 0 : index
    %c0_157 = arith.constant 0 : index
    %c0_158 = arith.constant 0 : index
    %251 = vector.load %arg9[%c1_155, %c0_156, %c0_157, %c0_158] : memref<3x1x8x128xf32, #tpu.memory_space<vmem>>, vector<1x1x8x128xf32>
    %252 = vector.shape_cast %251 : vector<1x1x8x128xf32> to vector<8x128xf32>
    %253 = vector.shape_cast %250 : vector<8x128xf32> to vector<1x1x8x128xf32>
    tpu.vector_store %arg9[%c1_155, %c0_156, %c0_157, %c0_158], %253 {strides = array<i32>} : memref<3x1x8x128xf32, #tpu.memory_space<vmem>>, vector<1x1x8x128xf32>,
    %cst_159 = arith.constant dense<0xFF800000> : vector<128xf32>
    %254 = vector.multi_reduction <maximumf>, %250, %cst_159 [0] : vector<8x128xf32> to vector<128xf32>
    %255 = vector.shape_cast %254 : vector<128xf32> to vector<1x128xf32>
    %256 = vector.broadcast %255 : vector<1x128xf32> to vector<8x128xf32>
    %257 = arith.subf %250, %256 : vector<8x128xf32>
    %258 = math.exp %257 : vector<8x128xf32>
    %cst_160 = arith.constant dense<0.000000e+00> : vector<128xf32>
    %259 = vector.multi_reduction <add>, %258, %cst_160 [0] : vector<8x128xf32> to vector<128xf32>
    %260 = vector.shape_cast %259 : vector<128xf32> to vector<1x128xf32>
    %261 = tpu.reciprocal %260 {approx = true} : vector<1x128xf32> -> vector<1x128xf32>
    %262 = vector.broadcast %261 : vector<1x128xf32> to vector<8x128xf32>
    %263 = arith.mulf %258, %262 : vector<8x128xf32>
    %264 = vector.broadcast %1 : vector<1x128xf32> to vector<8x128xf32>
    %265 = arith.mulf %263, %264 : vector<8x128xf32>
    %c2_161 = arith.constant 2 : index
    %c0_162 = arith.constant 0 : index
    %c0_163 = arith.constant 0 : index
    %266 = vector.load %arg3[%c2_161, %c0_162, %c0_163] : memref<3x16x8xbf16, #tpu.memory_space<vmem>>, vector<1x16x8xbf16>
    %267 = vector.shape_cast %266 : vector<1x16x8xbf16> to vector<16x8xbf16>
    %268 = arith.truncf %265 : vector<8x128xf32> to vector<8x128xbf16>
    %cst_164 = arith.constant dense<0.000000e+00> : vector<16x128xf32>
    %269 = tpu.matmul %267, %268, %cst_164 {dimension_numbers = #tpu.dot_dimension_numbers<[1], [0], [0], [1], [0, 0, 1, 1], [], []>} : vector<16x8xbf16>, vector<8x128xbf16>, vector<16x128xf32> -> vector<16x128xf32>
    %c2_165 = arith.constant 2 : index
    %c0_166 = arith.constant 0 : index
    %c0_167 = arith.constant 0 : index
    %270 = vector.load %arg4[%c2_165, %c0_166, %c0_167] : memref<3x16x1xf32, #tpu.memory_space<vmem>>, vector<1x16x1xf32>
    %271 = vector.shape_cast %270 : vector<1x16x1xf32> to vector<16x1xf32>
    %272 = vector.broadcast %271 : vector<16x1xf32> to vector<16x128xf32>
    %273 = arith.addf %269, %272 : vector<16x128xf32>
    %274 = tpu.iota {dimensions = array<i32: 1>} : vector<16x128xi32>
    %c1_i32_168 = arith.constant 1 : i32
    %275 = vector.broadcast %c1_i32_168 : i32 to vector<16x128xi32>
    %276 = arith.cmpi sge, %274, %275 : vector<16x128xi32>
    %c1_i32_169 = arith.constant 1 : i32
    %277 = tpu.dynamic_rotate %273 by %c1_i32_169 dim 1 : vector<16x128xf32>, i32 -> vector<16x128xf32>
    %cst_170 = arith.constant 0.000000e+00 : f32
    %278 = vector.broadcast %cst_170 : f32 to vector<16x128xf32>
    %279 = arith.select %276, %277, %278 : vector<16x128xi1>, vector<16x128xf32>
    %c127_i32_171 = arith.constant 127 : i32
    %280 = vector.broadcast %c127_i32_171 : i32 to vector<16x128xi32>
    %281 = arith.cmpi slt, %274, %280 : vector<16x128xi32>
    %c127_i32_172 = arith.constant 127 : i32
    %282 = tpu.dynamic_rotate %273 by %c127_i32_172 dim 1 : vector<16x128xf32>, i32 -> vector<16x128xf32>
    %cst_173 = arith.constant 0.000000e+00 : f32
    %283 = vector.broadcast %cst_173 : f32 to vector<16x128xf32>
    %284 = arith.select %281, %282, %283 : vector<16x128xi1>, vector<16x128xf32>
    %285 = tpu.concatenate %279, %273, %284 in 0 : vector<16x128xf32>, vector<16x128xf32>, vector<16x128xf32> -> vector<48x128xf32>
    %286 = arith.truncf %285 : vector<48x128xf32> to vector<48x128xbf16>
    %c2_174 = arith.constant 2 : index
    %c0_175 = arith.constant 0 : index
    %c0_176 = arith.constant 0 : index
    %c0_177 = arith.constant 0 : index
    %287 = vector.load %arg5[%c2_174, %c0_175, %c0_176, %c0_177] : memref<3x4x16x48xbf16, #tpu.memory_space<vmem>>, vector<1x1x16x48xbf16>
    %288 = vector.shape_cast %287 : vector<1x1x16x48xbf16> to vector<16x48xbf16>
    %cst_178 = arith.constant dense<0.000000e+00> : vector<16x128xf32>
    %289 = tpu.matmul %288, %286, %cst_178 {dimension_numbers = #tpu.dot_dimension_numbers<[1], [0], [0], [1], [0, 0, 1, 1], [], []>} : vector<16x48xbf16>, vector<48x128xbf16>, vector<16x128xf32> -> vector<16x128xf32>
    %c2_179 = arith.constant 2 : index
    %c0_180 = arith.constant 0 : index
    %c0_181 = arith.constant 0 : index
    %c0_182 = arith.constant 0 : index
    %290 = vector.load %arg6[%c2_179, %c0_180, %c0_181, %c0_182] : memref<3x4x16x1xf32, #tpu.memory_space<vmem>>, vector<1x1x16x1xf32>
    %291 = vector.shape_cast %290 : vector<1x1x16x1xf32> to vector<16x1xf32>
    %292 = vector.broadcast %291 : vector<16x1xf32> to vector<16x128xf32>
    %293 = arith.addf %289, %292 : vector<16x128xf32>
    %cst_183 = arith.constant 0.000000e+00 : f32
    %294 = vector.broadcast %cst_183 : f32 to vector<16x128xf32>
    %295 = arith.maximumf %293, %294 : vector<16x128xf32>
    %296 = arith.addf %273, %295 : vector<16x128xf32>
    %297 = vector.broadcast %1 : vector<1x128xf32> to vector<16x128xf32>
    %298 = arith.mulf %296, %297 : vector<16x128xf32>
    %c2_i32_184 = arith.constant 2 : i32
    %299 = vector.broadcast %c2_i32_184 : i32 to vector<16x128xi32>
    %300 = arith.cmpi sge, %274, %299 : vector<16x128xi32>
    %c2_i32_185 = arith.constant 2 : i32
    %301 = tpu.dynamic_rotate %298 by %c2_i32_185 dim 1 : vector<16x128xf32>, i32 -> vector<16x128xf32>
    %cst_186 = arith.constant 0.000000e+00 : f32
    %302 = vector.broadcast %cst_186 : f32 to vector<16x128xf32>
    %303 = arith.select %300, %301, %302 : vector<16x128xi1>, vector<16x128xf32>
    %c126_i32_187 = arith.constant 126 : i32
    %304 = vector.broadcast %c126_i32_187 : i32 to vector<16x128xi32>
    %305 = arith.cmpi slt, %274, %304 : vector<16x128xi32>
    %c126_i32_188 = arith.constant 126 : i32
    %306 = tpu.dynamic_rotate %298 by %c126_i32_188 dim 1 : vector<16x128xf32>, i32 -> vector<16x128xf32>
    %cst_189 = arith.constant 0.000000e+00 : f32
    %307 = vector.broadcast %cst_189 : f32 to vector<16x128xf32>
    %308 = arith.select %305, %306, %307 : vector<16x128xi1>, vector<16x128xf32>
    %309 = tpu.concatenate %303, %298, %308 in 0 : vector<16x128xf32>, vector<16x128xf32>, vector<16x128xf32> -> vector<48x128xf32>
    %310 = arith.truncf %309 : vector<48x128xf32> to vector<48x128xbf16>
    %c2_190 = arith.constant 2 : index
    %c1_191 = arith.constant 1 : index
    %c0_192 = arith.constant 0 : index
    %c0_193 = arith.constant 0 : index
    %311 = vector.load %arg5[%c2_190, %c1_191, %c0_192, %c0_193] : memref<3x4x16x48xbf16, #tpu.memory_space<vmem>>, vector<1x1x16x48xbf16>
    %312 = vector.shape_cast %311 : vector<1x1x16x48xbf16> to vector<16x48xbf16>
    %cst_194 = arith.constant dense<0.000000e+00> : vector<16x128xf32>
    %313 = tpu.matmul %312, %310, %cst_194 {dimension_numbers = #tpu.dot_dimension_numbers<[1], [0], [0], [1], [0, 0, 1, 1], [], []>} : vector<16x48xbf16>, vector<48x128xbf16>, vector<16x128xf32> -> vector<16x128xf32>
    %c2_195 = arith.constant 2 : index
    %c1_196 = arith.constant 1 : index
    %c0_197 = arith.constant 0 : index
    %c0_198 = arith.constant 0 : index
    %314 = vector.load %arg6[%c2_195, %c1_196, %c0_197, %c0_198] : memref<3x4x16x1xf32, #tpu.memory_space<vmem>>, vector<1x1x16x1xf32>
    %315 = vector.shape_cast %314 : vector<1x1x16x1xf32> to vector<16x1xf32>
    %316 = vector.broadcast %315 : vector<16x1xf32> to vector<16x128xf32>
    %317 = arith.addf %313, %316 : vector<16x128xf32>
    %cst_199 = arith.constant 0.000000e+00 : f32
    %318 = vector.broadcast %cst_199 : f32 to vector<16x128xf32>
    %319 = arith.maximumf %317, %318 : vector<16x128xf32>
    %320 = arith.addf %298, %319 : vector<16x128xf32>
    %321 = vector.broadcast %1 : vector<1x128xf32> to vector<16x128xf32>
    %322 = arith.mulf %320, %321 : vector<16x128xf32>
    %c4_i32_200 = arith.constant 4 : i32
    %323 = vector.broadcast %c4_i32_200 : i32 to vector<16x128xi32>
    %324 = arith.cmpi sge, %274, %323 : vector<16x128xi32>
    %c4_i32_201 = arith.constant 4 : i32
    %325 = tpu.dynamic_rotate %322 by %c4_i32_201 dim 1 : vector<16x128xf32>, i32 -> vector<16x128xf32>
    %cst_202 = arith.constant 0.000000e+00 : f32
    %326 = vector.broadcast %cst_202 : f32 to vector<16x128xf32>
    %327 = arith.select %324, %325, %326 : vector<16x128xi1>, vector<16x128xf32>
    %c124_i32_203 = arith.constant 124 : i32
    %328 = vector.broadcast %c124_i32_203 : i32 to vector<16x128xi32>
    %329 = arith.cmpi slt, %274, %328 : vector<16x128xi32>
    %c124_i32_204 = arith.constant 124 : i32
    %330 = tpu.dynamic_rotate %322 by %c124_i32_204 dim 1 : vector<16x128xf32>, i32 -> vector<16x128xf32>
    %cst_205 = arith.constant 0.000000e+00 : f32
    %331 = vector.broadcast %cst_205 : f32 to vector<16x128xf32>
    %332 = arith.select %329, %330, %331 : vector<16x128xi1>, vector<16x128xf32>
    %333 = tpu.concatenate %327, %322, %332 in 0 : vector<16x128xf32>, vector<16x128xf32>, vector<16x128xf32> -> vector<48x128xf32>
    %334 = arith.truncf %333 : vector<48x128xf32> to vector<48x128xbf16>
    %c2_206 = arith.constant 2 : index
    %c2_207 = arith.constant 2 : index
    %c0_208 = arith.constant 0 : index
    %c0_209 = arith.constant 0 : index
    %335 = vector.load %arg5[%c2_206, %c2_207, %c0_208, %c0_209] : memref<3x4x16x48xbf16, #tpu.memory_space<vmem>>, vector<1x1x16x48xbf16>
    %336 = vector.shape_cast %335 : vector<1x1x16x48xbf16> to vector<16x48xbf16>
    %cst_210 = arith.constant dense<0.000000e+00> : vector<16x128xf32>
    %337 = tpu.matmul %336, %334, %cst_210 {dimension_numbers = #tpu.dot_dimension_numbers<[1], [0], [0], [1], [0, 0, 1, 1], [], []>} : vector<16x48xbf16>, vector<48x128xbf16>, vector<16x128xf32> -> vector<16x128xf32>
    %c2_211 = arith.constant 2 : index
    %c2_212 = arith.constant 2 : index
    %c0_213 = arith.constant 0 : index
    %c0_214 = arith.constant 0 : index
    %338 = vector.load %arg6[%c2_211, %c2_212, %c0_213, %c0_214] : memref<3x4x16x1xf32, #tpu.memory_space<vmem>>, vector<1x1x16x1xf32>
    %339 = vector.shape_cast %338 : vector<1x1x16x1xf32> to vector<16x1xf32>
    %340 = vector.broadcast %339 : vector<16x1xf32> to vector<16x128xf32>
    %341 = arith.addf %337, %340 : vector<16x128xf32>
    %cst_215 = arith.constant 0.000000e+00 : f32
    %342 = vector.broadcast %cst_215 : f32 to vector<16x128xf32>
    %343 = arith.maximumf %341, %342 : vector<16x128xf32>
    %344 = arith.addf %322, %343 : vector<16x128xf32>
    %345 = vector.broadcast %1 : vector<1x128xf32> to vector<16x128xf32>
    %346 = arith.mulf %344, %345 : vector<16x128xf32>
    %c8_i32_216 = arith.constant 8 : i32
    %347 = vector.broadcast %c8_i32_216 : i32 to vector<16x128xi32>
    %348 = arith.cmpi sge, %274, %347 : vector<16x128xi32>
    %c8_i32_217 = arith.constant 8 : i32
    %349 = tpu.dynamic_rotate %346 by %c8_i32_217 dim 1 : vector<16x128xf32>, i32 -> vector<16x128xf32>
    %cst_218 = arith.constant 0.000000e+00 : f32
    %350 = vector.broadcast %cst_218 : f32 to vector<16x128xf32>
    %351 = arith.select %348, %349, %350 : vector<16x128xi1>, vector<16x128xf32>
    %c120_i32_219 = arith.constant 120 : i32
    %352 = vector.broadcast %c120_i32_219 : i32 to vector<16x128xi32>
    %353 = arith.cmpi slt, %274, %352 : vector<16x128xi32>
    %c120_i32_220 = arith.constant 120 : i32
    %354 = tpu.dynamic_rotate %346 by %c120_i32_220 dim 1 : vector<16x128xf32>, i32 -> vector<16x128xf32>
    %cst_221 = arith.constant 0.000000e+00 : f32
    %355 = vector.broadcast %cst_221 : f32 to vector<16x128xf32>
    %356 = arith.select %353, %354, %355 : vector<16x128xi1>, vector<16x128xf32>
    %357 = tpu.concatenate %351, %346, %356 in 0 : vector<16x128xf32>, vector<16x128xf32>, vector<16x128xf32> -> vector<48x128xf32>
    %358 = arith.truncf %357 : vector<48x128xf32> to vector<48x128xbf16>
    %c2_222 = arith.constant 2 : index
    %c3_223 = arith.constant 3 : index
    %c0_224 = arith.constant 0 : index
    %c0_225 = arith.constant 0 : index
    %359 = vector.load %arg5[%c2_222, %c3_223, %c0_224, %c0_225] : memref<3x4x16x48xbf16, #tpu.memory_space<vmem>>, vector<1x1x16x48xbf16>
    %360 = vector.shape_cast %359 : vector<1x1x16x48xbf16> to vector<16x48xbf16>
    %cst_226 = arith.constant dense<0.000000e+00> : vector<16x128xf32>
    %361 = tpu.matmul %360, %358, %cst_226 {dimension_numbers = #tpu.dot_dimension_numbers<[1], [0], [0], [1], [0, 0, 1, 1], [], []>} : vector<16x48xbf16>, vector<48x128xbf16>, vector<16x128xf32> -> vector<16x128xf32>
    %c2_227 = arith.constant 2 : index
    %c3_228 = arith.constant 3 : index
    %c0_229 = arith.constant 0 : index
    %c0_230 = arith.constant 0 : index
    %362 = vector.load %arg6[%c2_227, %c3_228, %c0_229, %c0_230] : memref<3x4x16x1xf32, #tpu.memory_space<vmem>>, vector<1x1x16x1xf32>
    %363 = vector.shape_cast %362 : vector<1x1x16x1xf32> to vector<16x1xf32>
    %364 = vector.broadcast %363 : vector<16x1xf32> to vector<16x128xf32>
    %365 = arith.addf %361, %364 : vector<16x128xf32>
    %cst_231 = arith.constant 0.000000e+00 : f32
    %366 = vector.broadcast %cst_231 : f32 to vector<16x128xf32>
    %367 = arith.maximumf %365, %366 : vector<16x128xf32>
    %368 = arith.addf %346, %367 : vector<16x128xf32>
    %369 = vector.broadcast %1 : vector<1x128xf32> to vector<16x128xf32>
    %370 = arith.mulf %368, %369 : vector<16x128xf32>
    %c2_232 = arith.constant 2 : index
    %c0_233 = arith.constant 0 : index
    %c0_234 = arith.constant 0 : index
    %371 = vector.load %arg7[%c2_232, %c0_233, %c0_234] : memref<3x8x16xbf16, #tpu.memory_space<vmem>>, vector<1x8x16xbf16>
    %372 = vector.shape_cast %371 : vector<1x8x16xbf16> to vector<8x16xbf16>
    %373 = arith.truncf %370 : vector<16x128xf32> to vector<16x128xbf16>
    %cst_235 = arith.constant dense<0.000000e+00> : vector<8x128xf32>
    %374 = tpu.matmul %372, %373, %cst_235 {dimension_numbers = #tpu.dot_dimension_numbers<[1], [0], [0], [1], [0, 0, 1, 1], [], []>} : vector<8x16xbf16>, vector<16x128xbf16>, vector<8x128xf32> -> vector<8x128xf32>
    %c2_236 = arith.constant 2 : index
    %c0_237 = arith.constant 0 : index
    %c0_238 = arith.constant 0 : index
    %375 = vector.load %arg8[%c2_236, %c0_237, %c0_238] : memref<3x8x1xf32, #tpu.memory_space<vmem>>, vector<1x8x1xf32>
    %376 = vector.shape_cast %375 : vector<1x8x1xf32> to vector<8x1xf32>
    %377 = vector.broadcast %376 : vector<8x1xf32> to vector<8x128xf32>
    %378 = arith.addf %374, %377 : vector<8x128xf32>
    %379 = vector.broadcast %1 : vector<1x128xf32> to vector<8x128xf32>
    %380 = arith.mulf %378, %379 : vector<8x128xf32>
    %c2_239 = arith.constant 2 : index
    %c0_240 = arith.constant 0 : index
    %c0_241 = arith.constant 0 : index
    %c0_242 = arith.constant 0 : index
    %381 = vector.load %arg9[%c2_239, %c0_240, %c0_241, %c0_242] : memref<3x1x8x128xf32, #tpu.memory_space<vmem>>, vector<1x1x8x128xf32>
    %382 = vector.shape_cast %381 : vector<1x1x8x128xf32> to vector<8x128xf32>
    %383 = vector.shape_cast %380 : vector<8x128xf32> to vector<1x1x8x128xf32>
    tpu.vector_store %arg9[%c2_239, %c0_240, %c0_241, %c0_242], %383 {strides = array<i32>} : memref<3x1x8x128xf32, #tpu.memory_space<vmem>>, vector<1x1x8x128xf32>,
    return
  }
  func.func @transform_0(%arg0: i32) -> (i32, i32, i32) {
    %c0_i32 = arith.constant 0 : i32
    %c0_i32_0 = arith.constant 0 : i32
    %c0_i32_1 = arith.constant 0 : i32
    return %arg0, %c0_i32, %c0_i32_0 : i32, i32, i32
  }
  func.func @transform_1(%arg0: i32) -> (i32, i32, i32) {
    %c0_i32 = arith.constant 0 : i32
    %c0_i32_0 = arith.constant 0 : i32
    %c0_i32_1 = arith.constant 0 : i32
    return %arg0, %c0_i32, %c0_i32_0 : i32, i32, i32
  }
  func.func @transform_2(%arg0: i32) -> (i32, i32, i32) {
    %c0_i32 = arith.constant 0 : i32
    %c0_i32_0 = arith.constant 0 : i32
    %c0_i32_1 = arith.constant 0 : i32
    %c0_i32_2 = arith.constant 0 : i32
    return %c0_i32, %c0_i32_0, %c0_i32_1 : i32, i32, i32
  }
  func.func @transform_3(%arg0: i32) -> (i32, i32, i32) {
    %c0_i32 = arith.constant 0 : i32
    %c0_i32_0 = arith.constant 0 : i32
    %c0_i32_1 = arith.constant 0 : i32
    %c0_i32_2 = arith.constant 0 : i32
    return %c0_i32, %c0_i32_0, %c0_i32_1 : i32, i32, i32
  }
  func.func @transform_4(%arg0: i32) -> (i32, i32, i32, i32) {
    %c0_i32 = arith.constant 0 : i32
    %c0_i32_0 = arith.constant 0 : i32
    %c0_i32_1 = arith.constant 0 : i32
    %c0_i32_2 = arith.constant 0 : i32
    %c0_i32_3 = arith.constant 0 : i32
    return %c0_i32, %c0_i32_0, %c0_i32_1, %c0_i32_2 : i32, i32, i32, i32
  }
  func.func @transform_5(%arg0: i32) -> (i32, i32, i32, i32) {
    %c0_i32 = arith.constant 0 : i32
    %c0_i32_0 = arith.constant 0 : i32
    %c0_i32_1 = arith.constant 0 : i32
    %c0_i32_2 = arith.constant 0 : i32
    %c0_i32_3 = arith.constant 0 : i32
    return %c0_i32, %c0_i32_0, %c0_i32_1, %c0_i32_2 : i32, i32, i32, i32
  }
  func.func @transform_6(%arg0: i32) -> (i32, i32, i32) {
    %c0_i32 = arith.constant 0 : i32
    %c0_i32_0 = arith.constant 0 : i32
    %c0_i32_1 = arith.constant 0 : i32
    %c0_i32_2 = arith.constant 0 : i32
    return %c0_i32, %c0_i32_0, %c0_i32_1 : i32, i32, i32
  }
  func.func @transform_7(%arg0: i32) -> (i32, i32, i32) {
    %c0_i32 = arith.constant 0 : i32
    %c0_i32_0 = arith.constant 0 : i32
    %c0_i32_1 = arith.constant 0 : i32
    %c0_i32_2 = arith.constant 0 : i32
    return %c0_i32, %c0_i32_0, %c0_i32_1 : i32, i32, i32
  }
  func.func @transform_8(%arg0: i32) -> (i32, i32, i32, i32) {
    %c0_i32 = arith.constant 0 : i32
    %c0_i32_0 = arith.constant 0 : i32
    %c0_i32_1 = arith.constant 0 : i32
    %c0_i32_2 = arith.constant 0 : i32
    return %c0_i32, %arg0, %c0_i32_0, %c0_i32_1 : i32, i32, i32, i32
  }
}

</mosaic_0001>

<bundles_post_ra>
// kernel: multi_stage_forward.1
= control target key start
LH: loop header
LB: loop body
LE: loop exit
PB: predicated region body
PF: predicated region fallthrough
CT: control target
= control target key end

     0   :  { %s3087_s0 = inlined_call_operand.vmem [shape: f32[2,1,128], index: 0, kind: input, shape index: {}]   ;;  %s3088_s1 = inlined_call_operand.vmem [shape: f32[2,8,128], index: 1, kind: input, shape index: {}]   ;;  %s3089_s2 = inlined_call_operand.vmem [shape: bf16[3,16,8], index: 2, kind: input, shape index: {}]   ;;  %s3090_s3 = inlined_call_operand.vmem [shape: f32[3,16,1], index: 3, kind: input, shape index: {}]   ;;  %s3091_s4 = inlined_call_operand.vmem [shape: bf16[3,4,16,48], index: 4, kind: input, shape index: {}]   ;;  %s3092_s5 = inlined_call_operand.vmem [shape: f32[3,4,16,1], index: 5, kind: input, shape index: {}]   ;;  %s3093_s6 = inlined_call_operand.vmem [shape: bf16[3,8,16], index: 6, kind: input, shape index: {}]   ;;  %s3094_s7 = inlined_call_operand.vmem [shape: f32[3,8,1], index: 7, kind: input, shape index: {}]   ;;  %s3095_s8 = inlined_call_operand.hbm [shape: f32[3,2,8,128], index: 8, kind: output, shape index: {}]  }
   0x1   :  { %3114 = sst [smem:[#allocation8_spill]] %s3087_s0 }
   0x2   :  { %3115 = sst [smem:[#allocation9_spill]] %s3088_s1 }
   0x3   :  { %13 = vsyncpa [#allocation3], 0 }
   0x4   :  { %15 = vsyncpa [#allocation3 + $0x1], 0  ;;  %s2569_s27 = smov 0   ;;  %s2571_s28 = smov 0  }
   0x5   :  { %s2573_s29 = smov 0   ;;  %s2575_s30 = smov 0  }
   0x6 LB: > { %3116 = sst [smem:[#allocation5_spill]] %s2504_s29  ;;  %s2590_s9 = sadd.s32 4294967295, %s2508_s30   ;;  %s2508_s30 = sphi %s2575_s30, %s3148_s30   ;;  %s2504_s29 = sphi %s2573_s29, %s3150_s29   ;;  %s2500_s28 = sphi %s2571_s28, %s3152_s28   ;;  %s2496_s27 = sphi %s2569_s27, %s3151_s27  }
   0x7   : > { %s1859_s10 = sadd.s32 4294967294, %s2508_s30   ;;  %s2594_s11 = sadd.s32 1, %s2508_s30  }
   0x8   : > { %3117 = sst [smem:[#allocation6_spill]] %s2594_s11  ;;  %s206_s12 = sadd.s32 1, %s2504_s29 }
   0x9   : > { %s203_s13 = ssub.s32 %s2508_s30, %s2594_s11  ;;  %p216_p0 = scmp.ne.s32.totalorder %s2504_s29, %s2500_s28 }
   0xa   : > { %p204_p1 = scmp.eq.s32.totalorder %s203_s13, 0  ;;  %p217_p2 = scmp.eq.s32.totalorder %s2590_s9, 1 }
   0xb   : > { %p222_p3 = scmp.ne.s32.totalorder %s2500_s28, %s2496_s27  ;;  %p223_p4 = scmp.eq.s32.totalorder %s1859_s10, 1 }
   0xc   : > { %s2605_s14 = scalar_select %p204_p1, %s2504_s29, %s206_s12  }
   0xd   : > { %p2607_p5 = por %p217_p2, %p216_p0  ;;  %p2611_p6 = por %p223_p4, %p222_p3 }
   0xe   : > { %3118 = sst [smem:[#allocation7_spill]] %s2605_s14  ;;  %p1862_p7 = scmp.ge.s32.totalorder %s2508_s30, 1 }
   0xf   : > { %p272_p8 = scmp.lt.s32.totalorder %s2508_s30, 3 }
  0x11   : > { %p273_p9 = pnand %p1862_p7, %p272_p8 }
  0x12   : > { %p308_p10 = scmp.lt.s32.totalorder (!%p273_p9), %s2590_s9, 1  ;;  %v2510_v0 = vmov (!%p273_p9), 0.0   ;;  %vm2511_vm0 = vmmov (!%p273_p9), 0   ;;  %v321_v1 = vld [vmem:[%s3090_s3] sm:$0xff] (!%p273_p9)  ;;  %v2512_v2 = vmov (!%p273_p9), 0   ;;  %v322_v3 = vld [vmem:[%s3090_s3 + $0x8] sm:$0xff] (!%p273_p9)  ;;  %v387_v19 = vlaneseq (!%p273_p9) }
  0x13   : > { %276 = sbr.rel (%p273_p9) target bundleno = 5733 (0x1665), region = 52  ;;  %2091 = vmatprep.subr.bf16.mxu0 (!%p273_p9), %v2510_v0  ;;  %2093 = vmatprep.mubr.msk.bf16.mxu0 (!%p273_p9), %vm2511_vm0, %v2510_v0  ;;  %s3121_s1 = sld [smem:[#allocation9_spill]] (!%p273_p9)  ;;  %vm342_vm1 = vcmask (!%p273_p9), 1043456   ;;  %v408_v5 = vld [vmem:[%s3092_s5] sm:$0xff] (!%p273_p9)  ;;  %vm338_vm2 = vcmask (!%p273_p9), 64512   ;;  %v409_v18 = vld [vmem:[%s3092_s5 + $0x8] sm:$0xff] (!%p273_p9) }
  0x14   : > { %2300 = vset.pattern.permute.xlu0 (!%p273_p9), %v2512_v2  ;;  %2097 = vmatprep.subr.bf16.mxu1 (!%p273_p9), %v2510_v0  ;;  %v2422_v7 = vld [vmem:[%s3089_s2] sm:$0xff] (!%p273_p9)   ;;  %s3109_s17 = smov (!%p273_p9), 1   ;;  %s3110_s18 = smov (!%p273_p9), 127   ;;  %v2653_v20 = vand.u32 (!%p273_p9), 127, %v387_v19  ;;  %vm425_vm7 = vcmask (!%p273_p9), 392192   ;;  %v1878_v49 = vld [vmem:[%s3092_s5 + $0x18] sm:$0xff] (!%p273_p9) }
  0x15   : > { %325 = vperm.xlu0 (!%p273_p9), %2300, %v321_v1   ;;  %2103 = vmatprep.mubr.msk.bf16.mxu1 (!%p273_p9), %vm2511_vm0, %v2510_v0  ;;  %v2423_v32 = vld [vmem:[%s3091_s4] sm:$0xff] (!%p273_p9)   ;;  %s3126_s0 = sld [smem:[#allocation8_spill]] (!%p273_p9)  ;;  %s3102_s10 = smov (!%p273_p9), 126   ;;  %v1877_v50 = vld [vmem:[%s3092_s5 + $0x10] sm:$0xff] (!%p273_p9)  ;;  %v2424_v62 = vld [vmem:[%s3091_s4 + $0x8] sm:$0xff] (!%p273_p9)  }
  0x16   : > { %2311 = vset.pattern.permute.xlu1 (!%p273_p9), %v2512_v2  ;;  %vm389_vm3 = vcmp.ge.s32.totalorder (!%p273_p9), %v2653_v20, 1  ;;  %vm396_vm5 = vcmp.lt.s32.totalorder (!%p273_p9), %v2653_v20, 127  ;;  %s3100_s12 = smov (!%p273_p9), 2   ;;  %vm482_vm8 = vcmp.ge.s32.totalorder (!%p273_p9), %v2653_v20, 2  ;;  %vm489_vm10 = vcmp.lt.s32.totalorder (!%p273_p9), %v2653_v20, 126  ;;  %s3098_s24 = smov (!%p273_p9), 124  }
  0x17   : > { %vm2656_vm4 = vmpackc.low (!%p273_p9), %vm389_vm3, %vm389_vm3  ;;  %vm570_vm12 = vcmp.ge.s32.totalorder (!%p273_p9), %v2653_v20, 4  ;;  %vm577_vm14 = vcmp.lt.s32.totalorder (!%p273_p9), %v2653_v20, 124  ;;  %s3104_s13 = smov (!%p273_p9), 8   ;;  %vm658_vm3 = vcmp.ge.s32.totalorder (!%p273_p9), %v2653_v20, 8  ;;  %s3139_s21 = smov (!%p273_p9), 126  }
  0x18   : > { %vm2665_vm6 = vmpackc.low (!%p273_p9), %vm396_vm5, %vm396_vm5  ;;  %s3140_s22 = smov (!%p273_p9), 2   ;;  %s3141_s23 = smov (!%p273_p9), 124  }
  0x19   : > { %330 = vperm.xlu0 (!%p273_p9), %2300, %v322_v3   ;;  %vm2698_vm9 = vmpackc.low (!%p273_p9), %vm482_vm8, %vm482_vm8  ;;  %vm665_vm8 = vcmp.lt.s32.totalorder (!%p273_p9), %v2653_v20, 120  ;;  %s2521_s11 = smov (!%p273_p9), [#allocation2]  }
  0x1a   : > { %s2625_s19 = scalar_select %p308_p10, %s2590_s9, 1  ;;  %vm2707_vm11 = vmpackc.low %vm489_vm10, %vm489_vm10 }
  0x1b   : > { %vm2731_vm13 = vmpackc.low %vm570_vm12, %vm570_vm12  ;;  %vm754_vm12 = vcmask 130048   ;;  %s2450_s14 = sshll.u32 %s2521_s11, 4  ;;  %s2451_s14 = int_to_ptr.vmem [resolvable:$false] %s2450_s14 }
  0x1c   : > { %s1863_s20 = sshll.u32 %s2625_s19, 3  ;;  %s2682_s26 = scalar_lea.vmem %s3126_s0, %s2625_s19  ;;  %vm2740_vm15 = vmpackc.low %vm577_vm14, %vm577_vm14 }
  0x1d   : > { %s314_s25 = scalar_lea.vmem %s3121_s1, %s1863_s20  ;;  %412 = vperm.xlu0 %2300, %v408_v5   ;;  %v2685_v44 = vld [vmem:[%s2682_s26] ss:$0 sm:$0xff]  ;;  %s3106_s19 = smov 120   ;;  %vm2773_vm5 = vmpackc.low %vm658_vm3, %vm658_vm3 }
  0x1e   : > { %v317_v4 = vld [vmem:[%s314_s25] sm:$0xff]  ;;  %s3096_s25 = smov 4   ;;  %vm2782_vm10 = vmpackc.low %vm665_vm8, %vm665_vm8 }
  0x1f   : > { %v320_v6 = vpack.c.bf16 %v317_v4, %v317_v4 }
  0x21   : > { %v344_v8 = vsel %vm342_vm1, %v320_v6, 0 }
  0x22   : > { %2092 = vmatpush3.bf16.msra.mxu0 %v344_v8 }
  0x23   : > { %2107 = vmatprep.subr.bf16.mxu0 %v2510_v0 }
  0x25   : > { %2094 = vmatmul.mubr.msk.bf16.vlgmr.msra.gmra.mrb[0].mxu0 %vm338_vm2, %v2422_v7 }
  0x26   : > { %2113 = vmatprep.mubr.msk.bf16.mxu0 %vm2511_vm0, %v2510_v0 }
  0x94   : > { %v326_v9 = vpop.permute.xlu0 %325 }
  0x98   : > { %v331_v12 = vpop.permute.xlu0 %330 }
  0x9c   : > { %v413_v33 = vpop.permute.xlu0 %412 }
  0xf8   : > { %v380_v10 = vpop.f32.mrb[0].mxu0 }
  0xf9   : > { %v2095_v11 = vpop.f32.mrb[1].mxu0  ;;  %v381_v14 = vadd.f32 %v380_v10, %v326_v9 }
  0xfa   : > { %v383_v13 = vpop.f32.mrb[2].mxu0 }
  0xfb   : > { %v384_v15 = vadd.f32 %v383_v13, %v331_v12  ;;  %v2096_v16 = vpop.f32.mrb[3].mxu0 }
  0xfc   : > { %v1889_v16 = vld [vmem:[%s3092_s5 + $0x20] sm:$0xff] }
  0xfd   : > { %v2301_v17 = vpack.i.bf16 %v384_v15, %v381_v14  ;;  %v404_v29 = vpack.c.bf16 %v384_v15, %v381_v14 }
  0xff   : > { %2302 = vrot.lane.b32.xlu1 %v2301_v17, %s3109_s17 }
 0x103   : > { %2307 = vrot.lane.b32.xlu1 %v2301_v17, %s3110_s18 }
 0x107   : > { %417 = vperm.xlu1 %2311, %v409_v18  }
 0x171   : > { %v2303_v21 = vpop.permute.xlu1 %2302 }
 0x172   : > { %v2305_v22 = vunpack.i.h.bf16 %v2303_v21  ;;  %v2304_v23 = vunpack.i.l.bf16 %v2303_v21 }
 0x174   : > { %v1868_v25 = vpack.c.bf16 %v2305_v22, %v2304_v23 }
 0x175   : > { %v2308_v26 = vpop.permute.xlu1 %2307 }
 0x176   : > { %2098 = vmatpush3.bf16.msk.msra.mxu1 %vm2656_vm4, %v1868_v25  ;;  %v2310_v27 = vunpack.i.h.bf16 %v2308_v26  ;;  %v2309_v28 = vunpack.i.l.bf16 %v2308_v26 }
 0x177   : > { %2099 = vmatprep.subr.bf16.mxu1 %v2510_v0 }
 0x178   : > { %v1871_v31 = vpack.c.bf16 %v2310_v27, %v2309_v28 }
 0x17a   : > { %2100 = vmatpush3.bf16.msra.mxu1 %v404_v29 }
 0x17b   : > { %2101 = vmatprep.subr.bf16.mxu1 %v2510_v0 }
 0x17e   : > { %2102 = vmatpush3.bf16.msk.msra.mxu1 %vm2665_vm6, %v1871_v31  ;;  %v2425_v31 = vld [vmem:[%s3091_s4 + $0x10] sm:$0xff]  }
 0x17f   : > { %2117 = vmatprep.subr.bf16.mxu1 %v2510_v0 }
 0x181   : > { %2104 = vmatmul.mubr.msk.bf16.vlgmr.msra.gmra.mrb[0].mxu1 %vm425_vm7, %v2423_v32 }
 0x182   : > { %2123 = vmatprep.mubr.msk.bf16.mxu1 %vm2511_vm0, %v2510_v0 }
 0x186   : > { %v418_v35 = vpop.permute.xlu1 %417 }
 0x254   : > { %v463_v34 = vpop.f32.mrb[0].mxu1 }
 0x255   : > { %v464_v36 = vadd.f32 %v463_v34, %v413_v33  ;;  %v2105_v37 = vpop.f32.mrb[1].mxu1 }
 0x256   : > { %v466_v38 = vpop.f32.mrb[2].mxu1 }
 0x257   : > { %v470_v39 = vmax.f32 %v464_v36, 0.0  ;;  %v467_v40 = vadd.f32 %v466_v38, %v418_v35  ;;  %v2106_v41 = vpop.f32.mrb[3].mxu1 }
 0x259   : > { %v472_v42 = vadd.f32 %v470_v39, %v381_v14  ;;  %v471_v43 = vmax.f32 %v467_v40, 0.0 }
 0x25b   : > { %v473_v45 = vadd.f32 %v471_v43, %v384_v15  ;;  %v480_v46 = vmul.f32 %v2685_v44, %v472_v42  ;;  %v1890_v15 = vld [vmem:[%s3092_s5 + $0x28] sm:$0xff] }
 0x25d   : > { %v481_v47 = vmul.f32 %v2685_v44, %v473_v45 }
 0x25f   : > { %v2317_v48 = vpack.i.bf16 %v481_v47, %v480_v46  ;;  %v497_v59 = vpack.c.bf16 %v481_v47, %v480_v46 }
 0x261   : > { %2318 = vrot.lane.b32.xlu1 %v2317_v48, %s3102_s10  ;;  %2313 = vrot.lane.b32.xlu0 %v2317_v48, %s3100_s12  ;;  %v1902_v48 = vld [vmem:[%s3092_s5 + $0x38] sm:$0xff]  ;;  %s3142_s10 = smov 4  }
 0x265   : > { %512 = vperm.xlu1 %2311, %v1878_v49   ;;  %507 = vperm.xlu0 %2300, %v1877_v50   ;;  %v1901_v49 = vld [vmem:[%s3092_s5 + $0x30] sm:$0xff] }
 0x266   : > { %v1914_v50 = vld [vmem:[%s3090_s3 + $0x10] sm:$0xff] }
 0x2d3   : > { %v2314_v51 = vpop.permute.xlu0 %2313  ;;  %v2319_v56 = vpop.permute.xlu1 %2318 }
 0x2d4   : > { %v2316_v52 = vunpack.i.h.bf16 %v2314_v51  ;;  %v2315_v53 = vunpack.i.l.bf16 %v2314_v51  ;;  %v2321_v57 = vunpack.i.h.bf16 %v2319_v56  ;;  %v2320_v58 = vunpack.i.l.bf16 %v2319_v56  ;;  %v748_v51 = vld [vmem:[%s3094_s7] sm:$0xff] }
 0x2d6   : > { %v1881_v55 = vpack.c.bf16 %v2316_v52, %v2315_v53  ;;  %v1884_v61 = vpack.c.bf16 %v2321_v57, %v2320_v58  ;;  %v1915_v52 = vld [vmem:[%s3090_s3 + $0x18] sm:$0xff] }
 0x2d8   : > { %2108 = vmatpush3.bf16.msk.msra.mxu0 %vm2698_vm9, %v1881_v55 }
 0x2d9   : > { %2109 = vmatprep.subr.bf16.mxu0 %v2510_v0 }
 0x2dc   : > { %2110 = vmatpush3.bf16.msra.mxu0 %v497_v59 }
 0x2dd   : > { %2111 = vmatprep.subr.bf16.mxu0 %v2510_v0 }
 0x2e0   : > { %2112 = vmatpush3.bf16.msk.msra.mxu0 %vm2707_vm11, %v1884_v61 }
 0x2e1   : > { %2127 = vmatprep.subr.bf16.mxu0 %v2510_v0 }
 0x2e3   : > { %2114 = vmatmul.mubr.msk.bf16.vlgmr.msra.gmra.mrb[4].mxu0 %vm425_vm7, %v2424_v62 }
 0x2e4   : > { %2133 = vmatprep.mubr.msk.bf16.mxu0 %vm2511_vm0, %v2510_v0  ;;  %v508_v63 = vpop.permute.xlu0 %507  ;;  %v513_v4 = vpop.permute.xlu1 %512 }
 0x3b6   : > { %v557_v1 = vpop.f32.mrb[4].mxu0 }
 0x3b7   : > { %v558_v2 = vadd.f32 %v557_v1, %v508_v63  ;;  %v2115_v3 = vpop.f32.mrb[5].mxu0 }
 0x3b8   : > { %v560_v5 = vpop.f32.mrb[6].mxu0  ;;  %v2426_v3 = vld [vmem:[%s3091_s4 + $0x18] sm:$0xff]  }
 0x3b9   : > { %v564_v6 = vmax.f32 %v558_v2, 0.0  ;;  %v561_v7 = vadd.f32 %v560_v5, %v513_v4  ;;  %v2116_v8 = vpop.f32.mrb[7].mxu0 }
 0x3bb   : > { %v566_v9 = vadd.f32 %v564_v6, %v480_v46  ;;  %v565_v10 = vmax.f32 %v561_v7, 0.0 }
 0x3bd   : > { %v567_v11 = vadd.f32 %v565_v10, %v481_v47  ;;  %v568_v12 = vmul.f32 %v2685_v44, %v566_v9 }
 0x3bf   : > { %v569_v13 = vmul.f32 %v2685_v44, %v567_v11 }
 0x3c1   : > { %v2327_v14 = vpack.i.bf16 %v569_v13, %v568_v12  ;;  %v585_v27 = vpack.c.bf16 %v569_v13, %v568_v12 }
 0x3c3   : > { %2328 = vrot.lane.b32.xlu1 %v2327_v14, %s3098_s24  ;;  %2323 = vrot.lane.b32.xlu0 %v2327_v14, %s3096_s25  ;;  %s3143_s25 = smov 120   ;;  %s2028_s24 = sshll.u32 %s2590_s9, 7 }
 0x3c7   : > { %600 = vperm.xlu1 %2311, %v1890_v15   ;;  %595 = vperm.xlu0 %2300, %v1889_v16  }
 0x435   : > { %v2324_v17 = vpop.permute.xlu0 %2323  ;;  %v2329_v23 = vpop.permute.xlu1 %2328 }
 0x436   : > { %v2326_v18 = vunpack.i.h.bf16 %v2324_v17  ;;  %v2325_v19 = vunpack.i.l.bf16 %v2324_v17  ;;  %v2331_v25 = vunpack.i.h.bf16 %v2329_v23  ;;  %v2330_v26 = vunpack.i.l.bf16 %v2329_v23 }
 0x438   : > { %v1893_v22 = vpack.c.bf16 %v2326_v18, %v2325_v19  ;;  %v1896_v29 = vpack.c.bf16 %v2331_v25, %v2330_v26  ;;  %v746_v18 = vld [vmem:[%s3093_s6] sm:$0xf] }
 0x43a   : > { %2118 = vmatpush3.bf16.msk.msra.mxu1 %vm2731_vm13, %v1893_v22 }
 0x43b   : > { %2119 = vmatprep.subr.bf16.mxu1 %v2510_v0 }
 0x43e   : > { %2120 = vmatpush3.bf16.msra.mxu1 %v585_v27 }
 0x43f   : > { %2121 = vmatprep.subr.bf16.mxu1 %v2510_v0 }
 0x442   : > { %2122 = vmatpush3.bf16.msk.msra.mxu1 %vm2740_vm15, %v1896_v29 }
 0x443   : > { %2137 = vmatprep.subr.bf16.mxu1 %v2510_v0 }
 0x445   : > { %2124 = vmatmul.mubr.msk.bf16.vlgmr.msra.gmra.mrb[4].mxu1 %vm425_vm7, %v2425_v31 }
 0x446   : > { %2139 = vmatprep.mubr.msk.bf16.mxu1 %vm2511_vm0, %v2510_v0  ;;  %v596_v32 = vpop.permute.xlu0 %595  ;;  %v601_v36 = vpop.permute.xlu1 %600 }
 0x518   : > { %v645_v33 = vpop.f32.mrb[4].mxu1 }
 0x519   : > { %v646_v34 = vadd.f32 %v645_v33, %v596_v32  ;;  %v2125_v35 = vpop.f32.mrb[5].mxu1 }
 0x51a   : > { %v648_v37 = vpop.f32.mrb[6].mxu1 }
 0x51b   : > { %v652_v38 = vmax.f32 %v646_v34, 0.0  ;;  %v649_v39 = vadd.f32 %v648_v37, %v601_v36  ;;  %v2126_v40 = vpop.f32.mrb[7].mxu1 }
 0x51d   : > { %v654_v41 = vadd.f32 %v652_v38, %v568_v12  ;;  %v653_v42 = vmax.f32 %v649_v39, 0.0 }
 0x51f   : > { %v655_v43 = vadd.f32 %v653_v42, %v569_v13  ;;  %v656_v45 = vmul.f32 %v2685_v44, %v654_v41 }
 0x521   : > { %v657_v46 = vmul.f32 %v2685_v44, %v655_v43 }
 0x523   : > { %v2337_v47 = vpack.i.bf16 %v657_v46, %v656_v45  ;;  %v673_v63 = vpack.c.bf16 %v657_v46, %v656_v45 }
 0x525   : > { %2338 = vrot.lane.b32.xlu1 %v2337_v47, %s3106_s19  ;;  %2333 = vrot.lane.b32.xlu0 %v2337_v47, %s3104_s13  ;;  %s3108_s19 = sand.u32 1, %s2500_s28  }
 0x526   : > { %s2247_s13 = smul.u32 24, %s3108_s19  ;;  %s3146_s19 = smov 1  }
 0x528   : > { %s2809_s20 = scalar_lea.vmem [#allocation2], %s2247_s13  ;;  %s3144_s13 = smov 8  }
 0x529   : > { %688 = vperm.xlu1 %2311, %v1902_v48   ;;  %683 = vperm.xlu0 %2300, %v1901_v49   ;;  %s1788_s12 = sshll.u32 %s2809_s20, 4  ;;  %s3035_s12 = int_to_ptr.vmem [resolvable:$true] %s1788_s12 }
 0x52a   : > { %s2446_s29 = scalar_lea.vmem %s3035_s12, 384  ;;  %p2453_p0 = scmp.lt.s32.totalorder %s3035_s12, %s2451_s14 }
 0x52b   : > { %p2447_p11 = scmp.ne.s32.totalorder %s3035_s12, %s2446_s29 }
 0x52d   : > { %828 = vperm.xlu1 %2311, %v1914_v50   ;;  %751 = vperm.xlu0 %2300, %v748_v51   ;;  %p2448_p12 = pnand %p2447_p11, %p2607_p5 }
 0x52f   : > { %p2449_p13 = pneg %p2448_p12 }
 0x531   : > { %833 = vperm.xlu0 %2300, %v1915_v52  }
 0x597   : > { %v2334_v53 = vpop.permute.xlu0 %2333  ;;  %v2339_v59 = vpop.permute.xlu1 %2338 }
 0x598   : > { %v2336_v55 = vunpack.i.h.bf16 %v2334_v53  ;;  %v2335_v56 = vunpack.i.l.bf16 %v2334_v53  ;;  %v2341_v61 = vunpack.i.h.bf16 %v2339_v59  ;;  %v2340_v62 = vunpack.i.l.bf16 %v2339_v59  ;;  %v2427_v53 = vld [vmem:[%s3089_s2 + $0x8] sm:$0xff]  }
 0x59a   : > { %v1905_v58 = vpack.c.bf16 %v2336_v55, %v2335_v56  ;;  %v1908_v2 = vpack.c.bf16 %v2341_v61, %v2340_v62 }
 0x59c   : > { %2128 = vmatpush3.bf16.msk.msra.mxu0 %vm2773_vm5, %v1905_v58 }
 0x59d   : > { %2129 = vmatprep.subr.bf16.mxu0 %v2510_v0 }
 0x5a0   : > { %2130 = vmatpush3.bf16.msra.mxu0 %v673_v63 }
 0x5a1   : > { %2131 = vmatprep.subr.bf16.mxu0 %v2510_v0 }
 0x5a4   : > { %2132 = vmatpush3.bf16.msk.msra.mxu0 %vm2782_vm10, %v1908_v2 }
 0x5a5   : > { %2143 = vmatprep.subr.bf16.mxu0 %v2510_v0 }
 0x5a7   : > { %2134 = vmatmul.mubr.msk.bf16.vlgmr.msra.gmra.mrb[8].mxu0 %vm425_vm7, %v2426_v3 }
 0x5a8   : > { %2145 = vmatprep.mubr.msk.bf16.mxu0 %vm2511_vm0, %v2510_v0  ;;  %v684_v20 = vpop.permute.xlu0 %683  ;;  %v689_v7 = vpop.permute.xlu1 %688 }
 0x5ac   : > { %v752_v19 = vpop.permute.xlu0 %751  ;;  %v829_v56 = vpop.permute.xlu1 %828 }
 0x5b0   : > { %v834_v59 = vpop.permute.xlu0 %833 }
 0x67a   : > { %v733_v4 = vpop.f32.mrb[8].mxu0 }
 0x67b   : > { %v734_v5 = vadd.f32 %v733_v4, %v684_v20  ;;  %v2135_v6 = vpop.f32.mrb[9].mxu0  ;;  %v1921_v20 = vld [vmem:[%s3092_s5 + $0x48] sm:$0xff]  ;;  %v1920_v4 = vld [vmem:[%s3092_s5 + $0x40] sm:$0xff] }
 0x67c   : > { %v736_v8 = vpop.f32.mrb[10].mxu0 }
 0x67d   : > { %v740_v9 = vmax.f32 %v734_v5, 0.0  ;;  %v737_v10 = vadd.f32 %v736_v8, %v689_v7  ;;  %v2136_v11 = vpop.f32.mrb[11].mxu0 }
 0x67f   : > { %v742_v12 = vadd.f32 %v740_v9, %v656_v45  ;;  %v741_v13 = vmax.f32 %v737_v10, 0.0 }
 0x681   : > { %v743_v14 = vadd.f32 %v741_v13, %v657_v46  ;;  %v744_v15 = vmul.f32 %v2685_v44, %v742_v12 }
 0x683   : > { %v745_v16 = vmul.f32 %v2685_v44, %v743_v14  ;;  %v2428_v14 = vld [vmem:[%s3091_s4 + $0x20] sm:$0xff]  }
 0x685   : > { %v747_v17 = vpack.c.bf16 %v745_v16, %v744_v15 }
 0x687   : > { %2138 = vmatpush3.bf16.msra.mxu1 %v747_v17 }
 0x688   : > { %2149 = vmatprep.subr.bf16.mxu1 %v2510_v0 }
 0x68a   : > { %2140 = vmatmul.mubr.msk.bf16.vlgmr.msra.gmra.mrb[8].mxu1 %vm754_vm12, %v746_v18 }
 0x68b   : > { %2155 = vmatprep.mubr.msk.bf16.mxu1 %vm2511_vm0, %v2510_v0 }
 0x75d   : > { %v792_v22 = vpop.f32.mrb[8].mxu1 }
 0x75e   : > { %v793_v23 = vadd.f32 %v792_v22, %v752_v19  ;;  %v2141_v25 = vpop.f32.mrb[9].mxu1 }
 0x75f   : > { %v795_v26 = vpop.f32.mrb[10].mxu1 }
 0x760   : > { %v798_v27 = vmul.f32 %v2685_v44, %v793_v23  ;;  %v2142_v29 = vpop.f32.mrb[11].mxu1 }
 0x762   : > { %v799_v31 = vmul.f32 %v2685_v44, %v798_v27 }
 0x764   : > { %v801_v32 = vrot.slane %v799_v31, 4  ;;  %800 = vst [vmem:[%s2809_s20] sm:$0xff] %v799_v31 }
 0x766   : > { %v802_v33 = vmax.f32 %v799_v31, %v801_v32 }
 0x768   : > { %v803_v34 = vrot.slane %v802_v33, 2 }
 0x76a   : > { %v804_v35 = vmax.f32 %v802_v33, %v803_v34 }
 0x76c   : > { %v805_v36 = vrot.slane %v804_v35, 1 }
 0x76e   : > { %v806_v37 = vmax.f32 %v804_v35, %v805_v36  ;;  %v1933_v35 = vld [vmem:[%s3092_s5 + $0x58] sm:$0xff]  ;;  %v1932_v36 = vld [vmem:[%s3092_s5 + $0x50] sm:$0xff] }
 0x770   : > { %v807_v38 = vsub.f32 %v799_v31, %v806_v37 }
 0x772   : > { %v808_v39 = vmul.f32 1.442695, %v807_v38 }
 0x774   : > { %2437 = vpow2.f32 %v808_v39 }
 0x77e   : > { %v2438_v40 = vpop.eup %2437 }
 0x77f   : > { %v810_v41 = vrot.slane %v2438_v40, 4 }
 0x781   : > { %v811_v42 = vadd.f32 %v2438_v40, %v810_v41 }
 0x783   : > { %v812_v43 = vrot.slane %v811_v42, 2 }
 0x785   : > { %v813_v45 = vadd.f32 %v812_v43, %v811_v42 }
 0x787   : > { %v814_v46 = vrot.slane %v813_v45, 1 }
 0x789   : > { %v815_v47 = vadd.f32 %v814_v46, %v813_v45 }
 0x78b   : > { %2439 = vrcp.f32 %v815_v47  ;;  %v2429_v47 = vld [vmem:[%s3091_s4 + $0x28] sm:$0xff]  }
 0x795   : > { %v2440_v48 = vpop.eup %2439 }
 0x796   : > { %v817_v49 = vmul.f32 %v2440_v48, %v2438_v40 }
 0x798   : > { %v818_v50 = vmul.f32 %v2685_v44, %v817_v49 }
 0x79a   : > { %v822_v51 = vpack.c.bf16 %v818_v50, %v818_v50 }
 0x79c   : > { %v845_v52 = vsel %vm342_vm1, %v822_v51, 0 }
 0x79d   : > { %2144 = vmatpush3.bf16.msra.mxu0 %v845_v52 }
 0x79e   : > { %2159 = vmatprep.subr.bf16.mxu0 %v2510_v0 }
 0x7a0   : > { %2146 = vmatmul.mubr.msk.bf16.vlgmr.msra.gmra.mrb[12].mxu0 %vm338_vm2, %v2427_v53 }
 0x7a1   : > { %2165 = vmatprep.mubr.msk.bf16.mxu0 %vm2511_vm0, %v2510_v0 }
 0x873   : > { %v881_v55 = vpop.f32.mrb[12].mxu0 }
 0x874   : > { %v2147_v58 = vpop.f32.mrb[13].mxu0  ;;  %v882_v62 = vadd.f32 %v881_v55, %v829_v56 }
 0x875   : > { %v884_v61 = vpop.f32.mrb[14].mxu0 }
 0x876   : > { %v885_v63 = vadd.f32 %v884_v61, %v834_v59  ;;  %v2148_v2 = vpop.f32.mrb[15].mxu0 }
 0x878   : > { %v2347_v3 = vpack.i.bf16 %v885_v63, %v882_v62  ;;  %v901_v12 = vpack.c.bf16 %v885_v63, %v882_v62 }
 0x87a   : > { %2348 = vrot.lane.b32.xlu0 %v2347_v3, %s3110_s18  ;;  %2343 = vrot.lane.b32.xlu1 %v2347_v3, %s3109_s17  ;;  %s3145_s18 = smov 127   ;;  %s2452_s17 = scalar_lea.vmem %s2451_s14, 768 }
 0x87b   : > { %p2454_p1 = scmp.lt.s32.totalorder %s2452_s17, %s2446_s29 }
 0x87d   : > { %p2455_p2 = por %p2454_p1, %p2453_p0 }
 0x87e   : > { %916 = vperm.xlu0 %2300, %v1921_v20   ;;  %911 = vperm.xlu1 %2311, %v1920_v4   ;;  %v1945_v20 = vld [vmem:[%s3092_s5 + $0x68] sm:$0xff]  ;;  %v1944_v4 = vld [vmem:[%s3092_s5 + $0x60] sm:$0xff] }
 0x87f   : > { %p2456_p3 = pnand %p2455_p2, %p2449_p13 }
 0x8ec   : > { %v2344_v5 = vpop.permute.xlu1 %2343  ;;  %v2349_v9 = vpop.permute.xlu0 %2348 }
 0x8ed   : > { %v2346_v6 = vunpack.i.h.bf16 %v2344_v5  ;;  %v2345_v7 = vunpack.i.l.bf16 %v2344_v5  ;;  %v2351_v10 = vunpack.i.h.bf16 %v2349_v9  ;;  %v2350_v11 = vunpack.i.l.bf16 %v2349_v9 }
 0x8ef   : > { %v1924_v8 = vpack.c.bf16 %v2346_v6, %v2345_v7  ;;  %v1927_v13 = vpack.c.bf16 %v2351_v10, %v2350_v11 }
 0x8f1   : > { %2150 = vmatpush3.bf16.msk.msra.mxu1 %vm2656_vm4, %v1924_v8 }
 0x8f2   : > { %2151 = vmatprep.subr.bf16.mxu1 %v2510_v0 }
 0x8f5   : > { %2152 = vmatpush3.bf16.msra.mxu1 %v901_v12 }
 0x8f6   : > { %2153 = vmatprep.subr.bf16.mxu1 %v2510_v0 }
 0x8f9   : > { %2154 = vmatpush3.bf16.msk.msra.mxu1 %vm2665_vm6, %v1927_v13 }
 0x8fa   : > { %2169 = vmatprep.subr.bf16.mxu1 %v2510_v0 }
 0x8fc   : > { %2156 = vmatmul.mubr.msk.bf16.vlgmr.msra.gmra.mrb[12].mxu1 %vm425_vm7, %v2428_v14  ;;  %v2430_v14 = vld [vmem:[%s3091_s4 + $0x30] sm:$0xff]  }
 0x8fd   : > { %2175 = vmatprep.mubr.msk.bf16.mxu1 %vm2511_vm0, %v2510_v0  ;;  %v912_v15 = vpop.permute.xlu1 %911  ;;  %v917_v19 = vpop.permute.xlu0 %916 }
 0x9cf   : > { %v961_v16 = vpop.f32.mrb[12].mxu1 }
 0x9d0   : > { %v962_v17 = vadd.f32 %v961_v16, %v912_v15  ;;  %v2157_v18 = vpop.f32.mrb[13].mxu1 }
 0x9d1   : > { %v964_v22 = vpop.f32.mrb[14].mxu1 }
 0x9d2   : > { %v968_v23 = vmax.f32 %v962_v17, 0.0  ;;  %v965_v25 = vadd.f32 %v964_v22, %v917_v19  ;;  %v2158_v26 = vpop.f32.mrb[15].mxu1 }
 0x9d4   : > { %v970_v27 = vadd.f32 %v968_v23, %v882_v62  ;;  %v969_v29 = vmax.f32 %v965_v25, 0.0 }
 0x9d6   : > { %v971_v31 = vadd.f32 %v969_v29, %v885_v63  ;;  %v972_v32 = vmul.f32 %v2685_v44, %v970_v27 }
 0x9d8   : > { %v973_v33 = vmul.f32 %v2685_v44, %v971_v31 }
 0x9da   : > { %v2357_v34 = vpack.i.bf16 %v973_v33, %v972_v32  ;;  %v987_v45 = vpack.c.bf16 %v973_v33, %v972_v32 }
 0x9dc   : > { %2358 = vrot.lane.b32.xlu0 %v2357_v34, %s3139_s21  ;;  %2353 = vrot.lane.b32.xlu1 %v2357_v34, %s3140_s22 }
 0x9e0   : > { %1002 = vperm.xlu0 %2300, %v1933_v35   ;;  %997 = vperm.xlu1 %2311, %v1932_v36   ;;  %v1957_v35 = vld [vmem:[%s3092_s5 + $0x78] sm:$0xff]  ;;  %v1956_v36 = vld [vmem:[%s3092_s5 + $0x70] sm:$0xff] }
 0xa4e   : > { %v2354_v37 = vpop.permute.xlu1 %2353  ;;  %v2359_v41 = vpop.permute.xlu0 %2358 }
 0xa4f   : > { %v2356_v38 = vunpack.i.h.bf16 %v2354_v37  ;;  %v2355_v39 = vunpack.i.l.bf16 %v2354_v37  ;;  %v2361_v42 = vunpack.i.h.bf16 %v2359_v41  ;;  %v2360_v43 = vunpack.i.l.bf16 %v2359_v41  ;;  %v1972_v37 = vld [vmem:[%s3090_s3 + $0x20] sm:$0xff] }
 0xa51   : > { %v1936_v40 = vpack.c.bf16 %v2356_v38, %v2355_v39  ;;  %v1939_v46 = vpack.c.bf16 %v2361_v42, %v2360_v43  ;;  %v1967_v38 = vld [vmem:[%s3094_s7 + $0x8] sm:$0xff] }
 0xa52   : > { %v1973_v39 = vld [vmem:[%s3090_s3 + $0x28] sm:$0xff] }
 0xa53   : > { %2160 = vmatpush3.bf16.msk.msra.mxu0 %vm2698_vm9, %v1936_v40 }
 0xa54   : > { %2161 = vmatprep.subr.bf16.mxu0 %v2510_v0 }
 0xa57   : > { %2162 = vmatpush3.bf16.msra.mxu0 %v987_v45 }
 0xa58   : > { %2163 = vmatprep.subr.bf16.mxu0 %v2510_v0 }
 0xa5b   : > { %2164 = vmatpush3.bf16.msk.msra.mxu0 %vm2707_vm11, %v1939_v46 }
 0xa5c   : > { %2179 = vmatprep.subr.bf16.mxu0 %v2510_v0 }
 0xa5e   : > { %2166 = vmatmul.mubr.msk.bf16.vlgmr.msra.gmra.mrb[16].mxu0 %vm425_vm7, %v2429_v47 }
 0xa5f   : > { %2185 = vmatprep.mubr.msk.bf16.mxu0 %vm2511_vm0, %v2510_v0  ;;  %v998_v48 = vpop.permute.xlu1 %997  ;;  %v1003_v52 = vpop.permute.xlu0 %1002 }
 0xb31   : > { %v1047_v49 = vpop.f32.mrb[16].mxu0 }
 0xb32   : > { %v1048_v50 = vadd.f32 %v1047_v49, %v998_v48  ;;  %v2167_v51 = vpop.f32.mrb[17].mxu0 }
 0xb33   : > { %v1050_v53 = vpop.f32.mrb[18].mxu0 }
 0xb34   : > { %v1054_v55 = vmax.f32 %v1048_v50, 0.0  ;;  %v1051_v56 = vadd.f32 %v1050_v53, %v1003_v52  ;;  %v2168_v58 = vpop.f32.mrb[19].mxu0  ;;  %v2431_v50 = vld [vmem:[%s3091_s4 + $0x38] sm:$0xff]  }
 0xb36   : > { %v1056_v59 = vadd.f32 %v1054_v55, %v972_v32  ;;  %v1055_v61 = vmax.f32 %v1051_v56, 0.0 }
 0xb38   : > { %v1057_v62 = vadd.f32 %v1055_v61, %v973_v33  ;;  %v1058_v63 = vmul.f32 %v2685_v44, %v1056_v59 }
 0xb3a   : > { %v1059_v2 = vmul.f32 %v2685_v44, %v1057_v62 }
 0xb3c   : > { %v2367_v3 = vpack.i.bf16 %v1059_v2, %v1058_v63  ;;  %v1073_v12 = vpack.c.bf16 %v1059_v2, %v1058_v63 }
 0xb3e   : > { %2368 = vrot.lane.b32.xlu0 %v2367_v3, %s3141_s23  ;;  %2363 = vrot.lane.b32.xlu1 %v2367_v3, %s3142_s10 }
 0xb42   : > { %1088 = vperm.xlu0 %2300, %v1945_v20   ;;  %1083 = vperm.xlu1 %2311, %v1944_v4  }
 0xbb0   : > { %v2364_v5 = vpop.permute.xlu1 %2363  ;;  %v2369_v9 = vpop.permute.xlu0 %2368 }
 0xbb1   : > { %v2366_v6 = vunpack.i.h.bf16 %v2364_v5  ;;  %v2365_v7 = vunpack.i.l.bf16 %v2364_v5  ;;  %v2371_v10 = vunpack.i.h.bf16 %v2369_v9  ;;  %v2370_v11 = vunpack.i.l.bf16 %v2369_v9 }
 0xbb3   : > { %v1948_v8 = vpack.c.bf16 %v2366_v6, %v2365_v7  ;;  %v1951_v13 = vpack.c.bf16 %v2371_v10, %v2370_v11  ;;  %v1966_v6 = vld [vmem:[%s3093_s6 + $0x4] sm:$0xf] }
 0xbb5   : > { %2170 = vmatpush3.bf16.msk.msra.mxu1 %vm2731_vm13, %v1948_v8 }
 0xbb6   : > { %2171 = vmatprep.subr.bf16.mxu1 %v2510_v0 }
 0xbb9   : > { %2172 = vmatpush3.bf16.msra.mxu1 %v1073_v12 }
 0xbba   : > { %2173 = vmatprep.subr.bf16.mxu1 %v2510_v0 }
 0xbbd   : > { %2174 = vmatpush3.bf16.msk.msra.mxu1 %vm2740_vm15, %v1951_v13 }
 0xbbe   : > { %2189 = vmatprep.subr.bf16.mxu1 %v2510_v0 }
 0xbc0   : > { %2176 = vmatmul.mubr.msk.bf16.vlgmr.msra.gmra.mrb[16].mxu1 %vm425_vm7, %v2430_v14 }
 0xbc1   : > { %2191 = vmatprep.mubr.msk.bf16.mxu1 %vm2511_vm0, %v2510_v0  ;;  %v1084_v15 = vpop.permute.xlu1 %1083  ;;  %v1089_v19 = vpop.permute.xlu0 %1088 }
 0xc93   : > { %v1133_v16 = vpop.f32.mrb[16].mxu1 }
 0xc94   : > { %v1134_v17 = vadd.f32 %v1133_v16, %v1084_v15  ;;  %v2177_v18 = vpop.f32.mrb[17].mxu1 }
 0xc95   : > { %v1136_v22 = vpop.f32.mrb[18].mxu1 }
 0xc96   : > { %v1140_v23 = vmax.f32 %v1134_v17, 0.0  ;;  %v1137_v25 = vadd.f32 %v1136_v22, %v1089_v19  ;;  %v2178_v26 = vpop.f32.mrb[19].mxu1 }
 0xc98   : > { %v1142_v27 = vadd.f32 %v1140_v23, %v1058_v63  ;;  %v1141_v29 = vmax.f32 %v1137_v25, 0.0 }
 0xc9a   : > { %v1143_v31 = vadd.f32 %v1141_v29, %v1059_v2  ;;  %v1144_v32 = vmul.f32 %v2685_v44, %v1142_v27 }
 0xc9c   : > { %v1145_v33 = vmul.f32 %v2685_v44, %v1143_v31 }
 0xc9e   : > { %v2377_v34 = vpack.i.bf16 %v1145_v33, %v1144_v32  ;;  %v1159_v48 = vpack.c.bf16 %v1145_v33, %v1144_v32 }
 0xca0   : > { %2378 = vrot.lane.b32.xlu0 %v2377_v34, %s3143_s25  ;;  %2373 = vrot.lane.b32.xlu1 %v2377_v34, %s3144_s13 }
 0xca4   : > { %1174 = vperm.xlu0 %2300, %v1957_v35   ;;  %1169 = vperm.xlu1 %2311, %v1956_v36  }
 0xca8   : > { %1315 = vperm.xlu0 %2300, %v1972_v37   ;;  %1239 = vperm.xlu1 %2311, %v1967_v38  }
 0xcac   : > { %1320 = vperm.xlu1 %2311, %v1973_v39   ;;  %v2432_v39 = vld [vmem:[%s3089_s2 + $0x10] sm:$0xff]  }
 0xd12   : > { %v2374_v40 = vpop.permute.xlu1 %2373  ;;  %v2379_v45 = vpop.permute.xlu0 %2378 }
 0xd13   : > { %v2376_v41 = vunpack.i.h.bf16 %v2374_v40  ;;  %v2375_v42 = vunpack.i.l.bf16 %v2374_v40  ;;  %v2381_v46 = vunpack.i.h.bf16 %v2379_v45  ;;  %v2380_v47 = vunpack.i.l.bf16 %v2379_v45 }
 0xd15   : > { %v1960_v43 = vpack.c.bf16 %v2376_v41, %v2375_v42  ;;  %v1963_v49 = vpack.c.bf16 %v2381_v46, %v2380_v47 }
 0xd17   : > { %2180 = vmatpush3.bf16.msk.msra.mxu0 %vm2773_vm5, %v1960_v43 }
 0xd18   : > { %2181 = vmatprep.subr.bf16.mxu0 %v2510_v0 }
 0xd1b   : > { %2182 = vmatpush3.bf16.msra.mxu0 %v1159_v48 }
 0xd1c   : > { %2183 = vmatprep.subr.bf16.mxu0 %v2510_v0 }
 0xd1f   : > { %2184 = vmatpush3.bf16.msk.msra.mxu0 %vm2782_vm10, %v1963_v49 }
 0xd20   : > { %2195 = vmatprep.subr.bf16.mxu0 %v2510_v0 }
 0xd22   : > { %2186 = vmatmul.mubr.msk.bf16.vlgmr.msra.gmra.mrb[20].mxu0 %vm425_vm7, %v2431_v50  ;;  %v1979_v50 = vld [vmem:[%s3092_s5 + $0x88] sm:$0xff] }
 0xd23   : > { %2197 = vmatprep.mubr.msk.bf16.mxu0 %vm2511_vm0, %v2510_v0  ;;  %v1170_v51 = vpop.permute.xlu1 %1169  ;;  %v1175_v56 = vpop.permute.xlu0 %1174 }
 0xd27   : > { %v1240_v7 = vpop.permute.xlu1 %1239  ;;  %v1316_v41 = vpop.permute.xlu0 %1315 }
 0xd2b   : > { %v1321_v43 = vpop.permute.xlu1 %1320 }
 0xdf5   : > { %v1219_v52 = vpop.f32.mrb[20].mxu0 }
 0xdf6   : > { %v1220_v53 = vadd.f32 %v1219_v52, %v1170_v51  ;;  %v2187_v55 = vpop.f32.mrb[21].mxu0  ;;  %v1978_v51 = vld [vmem:[%s3092_s5 + $0x80] sm:$0xff] }
 0xdf7   : > { %v1222_v58 = vpop.f32.mrb[22].mxu0 }
 0xdf8   : > { %v1226_v59 = vmax.f32 %v1220_v53, 0.0  ;;  %v1223_v61 = vadd.f32 %v1222_v58, %v1175_v56  ;;  %v2188_v62 = vpop.f32.mrb[23].mxu0 }
 0xdfa   : > { %v1228_v63 = vadd.f32 %v1226_v59, %v1144_v32  ;;  %v1227_v2 = vmax.f32 %v1223_v61, 0.0 }
 0xdfc   : > { %v1229_v3 = vadd.f32 %v1227_v2, %v1145_v33  ;;  %v1230_v20 = vmul.f32 %v2685_v44, %v1228_v63  ;;  %v2433_v2 = vld [vmem:[%s3091_s4 + $0x40] sm:$0xff]  }
 0xdfe   : > { %v1231_v4 = vmul.f32 %v2685_v44, %v1229_v3 }
 0xe00   : > { %v1234_v5 = vpack.c.bf16 %v1231_v4, %v1230_v20 }
 0xe02   : > { %2190 = vmatpush3.bf16.msra.mxu1 %v1234_v5 }
 0xe03   : > { %2201 = vmatprep.subr.bf16.mxu1 %v2510_v0 }
 0xe05   : > { %2192 = vmatmul.mubr.msk.bf16.vlgmr.msra.gmra.mrb[20].mxu1 %vm754_vm12, %v1966_v6 }
 0xe06   : > { %2207 = vmatprep.mubr.msk.bf16.mxu1 %vm2511_vm0, %v2510_v0 }
 0xed8   : > { %v1279_v8 = vpop.f32.mrb[20].mxu1 }
 0xed9   : > { %v1280_v9 = vadd.f32 %v1279_v8, %v1240_v7  ;;  %v2193_v10 = vpop.f32.mrb[21].mxu1 }
 0xeda   : > { %v1282_v11 = vpop.f32.mrb[22].mxu1 }
 0xedb   : > { %v1285_v12 = vmul.f32 %v2685_v44, %v1280_v9  ;;  %v2194_v13 = vpop.f32.mrb[23].mxu1 }
 0xedd   : > { %v1288_v14 = vrot.slane %v1285_v12, 4  ;;  %1969 = vst [vmem:[%s2809_s20 + $0x8] sm:$0xff] %v1285_v12 }
 0xedf   : > { %v1289_v15 = vmax.f32 %v1285_v12, %v1288_v14 }
 0xee1   : > { %v1290_v16 = vrot.slane %v1289_v15, 2 }
 0xee3   : > { %v1291_v17 = vmax.f32 %v1289_v15, %v1290_v16  ;;  %v1991_v15 = vld [vmem:[%s3092_s5 + $0x98] sm:$0xff]  ;;  %v1990_v16 = vld [vmem:[%s3092_s5 + $0x90] sm:$0xff] }
 0xee5   : > { %v1292_v18 = vrot.slane %v1291_v17, 1 }
 0xee7   : > { %v1293_v19 = vmax.f32 %v1291_v17, %v1292_v18 }
 0xee9   : > { %v1294_v22 = vsub.f32 %v1285_v12, %v1293_v19 }
 0xeeb   : > { %v1295_v23 = vmul.f32 1.442695, %v1294_v22 }
 0xeed   : > { %2441 = vpow2.f32 %v1295_v23 }
 0xef7   : > { %v2442_v25 = vpop.eup %2441 }
 0xef8   : > { %v1297_v26 = vrot.slane %v2442_v25, 4 }
 0xefa   : > { %v1298_v27 = vadd.f32 %v2442_v25, %v1297_v26 }
 0xefc   : > { %v1299_v29 = vrot.slane %v1298_v27, 2 }
 0xefe   : > { %v1300_v31 = vadd.f32 %v1299_v29, %v1298_v27 }
 0xf00   : > { %v1301_v32 = vrot.slane %v1300_v31, 1 }
 0xf02   : > { %v1302_v33 = vadd.f32 %v1301_v32, %v1300_v31  ;;  %v2434_v31 = vld [vmem:[%s3091_s4 + $0x48] sm:$0xff]  }
 0xf04   : > { %2443 = vrcp.f32 %v1302_v33 }
 0xf0e   : > { %v2444_v34 = vpop.eup %2443 }
 0xf0f   : > { %v1304_v35 = vmul.f32 %v2444_v34, %v2442_v25 }
 0xf11   : > { %v1305_v36 = vmul.f32 %v2685_v44, %v1304_v35 }
 0xf13   : > { %v1309_v37 = vpack.c.bf16 %v1305_v36, %v1305_v36 }
 0xf15   : > { %v1332_v38 = vsel %vm342_vm1, %v1309_v37, 0 }
 0xf16   : > { %2196 = vmatpush3.bf16.msra.mxu0 %v1332_v38 }
 0xf17   : > { %2211 = vmatprep.subr.bf16.mxu0 %v2510_v0 }
 0xf19   : > { %2198 = vmatmul.mubr.msk.bf16.vlgmr.msra.gmra.mrb[24].mxu0 %vm338_vm2, %v2432_v39 }
 0xf1a   : > { %2217 = vmatprep.mubr.msk.bf16.mxu0 %vm2511_vm0, %v2510_v0 }
 0xfec   : > { %v1368_v40 = vpop.f32.mrb[24].mxu0 }
 0xfed   : > { %v2199_v42 = vpop.f32.mrb[25].mxu0  ;;  %v1369_v46 = vadd.f32 %v1368_v40, %v1316_v41 }
 0xfee   : > { %v1371_v45 = vpop.f32.mrb[26].mxu0 }
 0xfef   : > { %v1372_v47 = vadd.f32 %v1371_v45, %v1321_v43  ;;  %v2200_v48 = vpop.f32.mrb[27].mxu0 }
 0xff1   : > { %v2387_v49 = vpack.i.bf16 %v1372_v47, %v1369_v46  ;;  %v1388_v62 = vpack.c.bf16 %v1372_v47, %v1369_v46 }
 0xff3   : > { %2388 = vrot.lane.b32.xlu1 %v2387_v49, %s3145_s18  ;;  %2383 = vrot.lane.b32.xlu0 %v2387_v49, %s3146_s19 }
 0xff7   : > { %1403 = vperm.xlu1 %2311, %v1979_v50   ;;  %1398 = vperm.xlu0 %2300, %v1978_v51  }
0x1065   : > { %v2384_v52 = vpop.permute.xlu0 %2383  ;;  %v2389_v58 = vpop.permute.xlu1 %2388 }
0x1066   : > { %v2386_v53 = vunpack.i.h.bf16 %v2384_v52  ;;  %v2385_v55 = vunpack.i.l.bf16 %v2384_v52  ;;  %v2391_v59 = vunpack.i.h.bf16 %v2389_v58  ;;  %v2390_v61 = vunpack.i.l.bf16 %v2389_v58  ;;  %v2435_v58 = vld [vmem:[%s3091_s4 + $0x50] sm:$0xff]  }
0x1068   : > { %v1982_v56 = vpack.c.bf16 %v2386_v53, %v2385_v55  ;;  %v1985_v63 = vpack.c.bf16 %v2391_v59, %v2390_v61 }
0x106a   : > { %2202 = vmatpush3.bf16.msk.msra.mxu1 %vm2656_vm4, %v1982_v56 }
0x106b   : > { %2203 = vmatprep.subr.bf16.mxu1 %v2510_v0 }
0x106e   : > { %2204 = vmatpush3.bf16.msra.mxu1 %v1388_v62 }
0x106f   : > { %2205 = vmatprep.subr.bf16.mxu1 %v2510_v0 }
0x1072   : > { %2206 = vmatpush3.bf16.msk.msra.mxu1 %vm2665_vm6, %v1985_v63 }
0x1073   : > { %2221 = vmatprep.subr.bf16.mxu1 %v2510_v0 }
0x1075   : > { %2208 = vmatmul.mubr.msk.bf16.vlgmr.msra.gmra.mrb[24].mxu1 %vm425_vm7, %v2433_v2 }
0x1076   : > { %2227 = vmatprep.mubr.msk.bf16.mxu1 %vm2511_vm0, %v2510_v0  ;;  %v1399_v24 = vpop.permute.xlu0 %1398  ;;  %v1404_v5 = vpop.permute.xlu1 %1403 }
0x1148   : > { %v1448_v3 = vpop.f32.mrb[24].mxu1 }
0x1149   : > { %v1449_v20 = vadd.f32 %v1448_v3, %v1399_v24  ;;  %v2209_v4 = vpop.f32.mrb[25].mxu1 }
0x114a   : > { %v1451_v6 = vpop.f32.mrb[26].mxu1 }
0x114b   : > { %v1455_v7 = vmax.f32 %v1449_v20, 0.0  ;;  %v1452_v8 = vadd.f32 %v1451_v6, %v1404_v5  ;;  %v2210_v9 = vpop.f32.mrb[27].mxu1  ;;  %v2445_v6 = vld [vmem:[%s2682_s26] ss:$0 sm:$0xff] }
0x114d   : > { %v1457_v10 = vadd.f32 %v1455_v7, %v1369_v46  ;;  %v1456_v11 = vmax.f32 %v1452_v8, 0.0  ;;  %v2003_v46 = vld [vmem:[%s3092_s5 + $0xa8] sm:$0xff] }
0x114f   : > { %v1458_v30 = vadd.f32 %v1456_v11, %v1372_v47  ;;  %v1459_v12 = vmul.f32 %v2685_v44, %v1457_v10  ;;  %v2002_v47 = vld [vmem:[%s3092_s5 + $0xa0] sm:$0xff]  ;;  %v2015_v10 = vld [vmem:[%s3092_s5 + $0xb8] sm:$0xff]  ;;  %v2014_v11 = vld [vmem:[%s3092_s5 + $0xb0] sm:$0xff] }
0x1151   : > { %v1460_v13 = vmul.f32 %v2685_v44, %v1458_v30  ;;  %v2025_v30 = vld [vmem:[%s3094_s7 + $0x10] sm:$0xff] }
0x1153   : > { %v2397_v14 = vpack.i.bf16 %v1460_v13, %v1459_v12  ;;  %v1474_v27 = vpack.c.bf16 %v1460_v13, %v1459_v12 }
0x1155   : > { %2398 = vrot.lane.b32.xlu1 %v2397_v14, %s3139_s21  ;;  %2393 = vrot.lane.b32.xlu0 %v2397_v14, %s3140_s22 }
0x1159   : > { %1489 = vperm.xlu1 %2311, %v1991_v15   ;;  %1484 = vperm.xlu0 %2300, %v1990_v16  }
0x11c7   : > { %v2394_v17 = vpop.permute.xlu0 %2393  ;;  %v2399_v23 = vpop.permute.xlu1 %2398 }
0x11c8   : > { %v2396_v18 = vunpack.i.h.bf16 %v2394_v17  ;;  %v2395_v19 = vunpack.i.l.bf16 %v2394_v17  ;;  %v2401_v25 = vunpack.i.h.bf16 %v2399_v23  ;;  %v2400_v26 = vunpack.i.l.bf16 %v2399_v23  ;;  %v2436_v23 = vld [vmem:[%s3091_s4 + $0x58] sm:$0xff]  }
0x11ca   : > { %v1994_v22 = vpack.c.bf16 %v2396_v18, %v2395_v19  ;;  %v1997_v29 = vpack.c.bf16 %v2401_v25, %v2400_v26 }
0x11cc   : > { %2212 = vmatpush3.bf16.msk.msra.mxu0 %vm2698_vm9, %v1994_v22 }
0x11cd   : > { %2213 = vmatprep.subr.bf16.mxu0 %v2510_v0 }
0x11d0   : > { %2214 = vmatpush3.bf16.msra.mxu0 %v1474_v27 }
0x11d1   : > { %2215 = vmatprep.subr.bf16.mxu0 %v2510_v0 }
0x11d4   : > { %2216 = vmatpush3.bf16.msk.msra.mxu0 %vm2707_vm11, %v1997_v29 }
0x11d5   : > { %2231 = vmatprep.subr.bf16.mxu0 %v2510_v0 }
0x11d7   : > { %2218 = vmatmul.mubr.msk.bf16.vlgmr.msra.gmra.mrb[28].mxu0 %vm425_vm7, %v2434_v31 }
0x11d8   : > { %2237 = vmatprep.mubr.msk.bf16.mxu0 %vm2511_vm0, %v2510_v0  ;;  %v1485_v54 = vpop.permute.xlu0 %1484  ;;  %v1490_v35 = vpop.permute.xlu1 %1489 }
0x12aa   : > { %v1534_v32 = vpop.f32.mrb[28].mxu0 }
0x12ab   : > { %v1535_v33 = vadd.f32 %v1534_v32, %v1485_v54  ;;  %v2219_v34 = vpop.f32.mrb[29].mxu0 }
0x12ac   : > { %v1537_v36 = vpop.f32.mrb[30].mxu0 }
0x12ad   : > { %v1541_v37 = vmax.f32 %v1535_v33, 0.0  ;;  %v1538_v38 = vadd.f32 %v1537_v36, %v1490_v35  ;;  %v2220_v39 = vpop.f32.mrb[31].mxu0 }
0x12af   : > { %v1543_v40 = vadd.f32 %v1541_v37, %v1459_v12  ;;  %v1542_v41 = vmax.f32 %v1538_v38, 0.0  ;;  %v2024_v38 = vld [vmem:[%s3093_s6 + $0x8] sm:$0xf] }
0x12b1   : > { %v1544_v60 = vadd.f32 %v1542_v41, %v1460_v13  ;;  %v1545_v42 = vmul.f32 %v2685_v44, %v1543_v40 }
0x12b3   : > { %v1546_v43 = vmul.f32 %v2685_v44, %v1544_v60 }
0x12b5   : > { %v2407_v45 = vpack.i.bf16 %v1546_v43, %v1545_v42  ;;  %v1560_v55 = vpack.c.bf16 %v1546_v43, %v1545_v42 }
0x12b7   : > { %2408 = vrot.lane.b32.xlu1 %v2407_v45, %s3141_s23  ;;  %2403 = vrot.lane.b32.xlu0 %v2407_v45, %s3142_s10  ;;  %s3040_s23 = scalar_lea.hbm %s3095_s8, %s2028_s24  ;;  %s3147_s10 = sand.u32 1, %s2500_s28  }
0x12b8   : > { %s3045_s9 = scalar_lea.sflag [#allocation3], %s3147_s10 }
0x12bb   : > { %1575 = vperm.xlu1 %2311, %v2003_v46   ;;  %1570 = vperm.xlu0 %2300, %v2002_v47  }
0x1329   : > { %v2404_v48 = vpop.permute.xlu0 %2403  ;;  %v2409_v44 = vpop.permute.xlu1 %2408 }
0x132a   : > { %v2406_v49 = vunpack.i.h.bf16 %v2404_v48  ;;  %v2405_v50 = vunpack.i.l.bf16 %v2404_v48  ;;  %v2411_v52 = vunpack.i.h.bf16 %v2409_v44  ;;  %v2410_v53 = vunpack.i.l.bf16 %v2409_v44 }
0x132c   : > { %v2006_v51 = vpack.c.bf16 %v2406_v49, %v2405_v50  ;;  %v2009_v56 = vpack.c.bf16 %v2411_v52, %v2410_v53 }
0x132e   : > { %2222 = vmatpush3.bf16.msk.msra.mxu1 %vm2731_vm13, %v2006_v51 }
0x132f   : > { %2223 = vmatprep.subr.bf16.mxu1 %v2510_v0 }
0x1332   : > { %2224 = vmatpush3.bf16.msra.mxu1 %v1560_v55 }
0x1333   : > { %2225 = vmatprep.subr.bf16.mxu1 %v2510_v0 }
0x1336   : > { %2226 = vmatpush3.bf16.msk.msra.mxu1 %vm2740_vm15, %v2009_v56 }
0x1337   : > { %2241 = vmatprep.subr.bf16.mxu1 %v2510_v0 }
0x1339   : > { %2228 = vmatmul.mubr.msk.bf16.vlgmr.msra.gmra.mrb[28].mxu1 %vm425_vm7, %v2435_v58 }
0x133a   : > { %2243 = vmatprep.mubr.msk.bf16.mxu1 %vm2511_vm0, %v2510_v0  ;;  %v1571_v21 = vpop.permute.xlu0 %1570  ;;  %v1576_v63 = vpop.permute.xlu1 %1575 }
0x140c   : > { %v1620_v59 = vpop.f32.mrb[28].mxu1 }
0x140d   : > { %v1621_v61 = vadd.f32 %v1620_v59, %v1571_v21  ;;  %v2229_v62 = vpop.f32.mrb[29].mxu1 }
0x140e   : > { %v1623_v2 = vpop.f32.mrb[30].mxu1 }
0x140f   : > { %v1627_v24 = vmax.f32 %v1621_v61, 0.0  ;;  %v1624_v3 = vadd.f32 %v1623_v2, %v1576_v63  ;;  %v2230_v20 = vpop.f32.mrb[31].mxu1 }
0x1411   : > { %v1629_v4 = vadd.f32 %v1627_v24, %v1545_v42  ;;  %v1628_v28 = vmax.f32 %v1624_v3, 0.0 }
0x1413   : > { %v1630_v5 = vadd.f32 %v1628_v28, %v1546_v43  ;;  %v1631_v7 = vmul.f32 %v2445_v6, %v1629_v4 }
0x1415   : > { %v1632_v8 = vmul.f32 %v2445_v6, %v1630_v5 }
0x1417   : > { %v2417_v9 = vpack.i.bf16 %v1632_v8, %v1631_v7  ;;  %v1646_v19 = vpack.c.bf16 %v1632_v8, %v1631_v7 }
0x1419   : > { %2418 = vrot.lane.b32.xlu1 %v2417_v9, %s3143_s25  ;;  %2413 = vrot.lane.b32.xlu0 %v2417_v9, %s3144_s13 }
0x141d   : > { %1661 = vperm.xlu1 %2311, %v2015_v10   ;;  %1656 = vperm.xlu0 %2300, %v2014_v11  }
0x1421   : > { %1726 = vperm.xlu0 %2300, %v2025_v30  }
0x148b   : > { %v2414_v12 = vpop.permute.xlu0 %2413  ;;  %v2419_v16 = vpop.permute.xlu1 %2418 }
0x148c   : > { %v2416_v13 = vunpack.i.h.bf16 %v2414_v12  ;;  %v2415_v14 = vunpack.i.l.bf16 %v2414_v12  ;;  %v2421_v17 = vunpack.i.h.bf16 %v2419_v16  ;;  %v2420_v18 = vunpack.i.l.bf16 %v2419_v16 }
0x148e   : > { %v2018_v15 = vpack.c.bf16 %v2416_v13, %v2415_v14  ;;  %v2021_v22 = vpack.c.bf16 %v2421_v17, %v2420_v18 }
0x1490   : > { %2232 = vmatpush3.bf16.msk.msra.mxu0 %vm2773_vm5, %v2018_v15 }
0x1491   : > { %2233 = vmatprep.subr.bf16.mxu0 %v2510_v0 }
0x1494   : > { %2234 = vmatpush3.bf16.msra.mxu0 %v1646_v19 }
0x1495   : > { %2235 = vmatprep.subr.bf16.mxu0 %v2510_v0 }
0x1498   : > { %2236 = vmatpush3.bf16.msk.msra.mxu0 %vm2782_vm10, %v2021_v22 }
0x149b   : > { %2238 = vmatmul.mubr.msk.bf16.vlgmr.msra.gmra.mrb[32].mxu0 %vm425_vm7, %v2436_v23 }
0x149c   : > { %v1657_v57 = vpop.permute.xlu0 %1656  ;;  %v1662_v29 = vpop.permute.xlu1 %1661 }
0x14a0   : > { %v1727_v39 = vpop.permute.xlu0 %1726 }
0x156e   : > { %v1706_v25 = vpop.f32.mrb[32].mxu0 }
0x156f   : > { %v1707_v26 = vadd.f32 %v1706_v25, %v1657_v57  ;;  %v2239_v27 = vpop.f32.mrb[33].mxu0 }
0x1570   : > { %v1709_v31 = vpop.f32.mrb[34].mxu0 }
0x1571   : > { %v1713_v54 = vmax.f32 %v1707_v26, 0.0  ;;  %v1710_v0 = vadd.f32 %v1709_v31, %v1662_v29  ;;  %v2240_v32 = vpop.f32.mrb[35].mxu0 }
0x1573   : > { %v1715_v33 = vadd.f32 %v1713_v54, %v1631_v7  ;;  %v1714_v34 = vmax.f32 %v1710_v0, 0.0 }
0x1575   : > { %v1716_v35 = vadd.f32 %v1714_v34, %v1632_v8  ;;  %v1717_v36 = vmul.f32 %v2445_v6, %v1715_v33 }
0x1577   : > { %v1718_v37 = vmul.f32 %v2445_v6, %v1716_v35 }
0x1579   : > { %v1721_v1 = vpack.c.bf16 %v1718_v37, %v1717_v36 }
0x157b   : > { %2242 = vmatpush3.bf16.msra.mxu1 %v1721_v1 }
0x157e   : > { %2244 = vmatmul.mubr.msk.bf16.vlgmr.msra.gmra.mrb[32].mxu1 %vm754_vm12, %v2024_v38 }
0x1651   : > { %v1766_v40 = vpop.f32.mrb[32].mxu1 }
0x1652   : > { %v1767_v41 = vadd.f32 %v1766_v40, %v1727_v39  ;;  %v2245_v60 = vpop.f32.mrb[33].mxu1 }
0x1653   : > { %v1769_v42 = vpop.f32.mrb[34].mxu1 }
0x1654   : > { %v1772_v43 = vmul.f32 %v2445_v6, %v1767_v41  ;;  %v2246_v45 = vpop.f32.mrb[35].mxu1 }
0x1656   : > { %2027 = vst [vmem:[%s2809_s20 + $0x10] sm:$0xff] %v1772_v43 }
0x1657   : > { %2459 = shalt.err (!%p2456_p3)
}
0x1658   : > { %s2460_s20 = scalar_lea.hbm %s3040_s23, 384  ;;  %s2464_s26 = scalar_lea.hbm %s3095_s8, 768 }
0x1659   : > { %p2461_p4 = scmp.ne.s32.totalorder %s3040_s23, %s2460_s20  ;;  %p2465_p9 = scmp.lt.u32.totalorder %s3040_s23, %s3095_s8 }
0x165a   : > { %p2466_p10 = scmp.lt.u32.totalorder %s2464_s26, %s2460_s20  ;;  %p2468_p12 = scmp.lt.u32.totalorder %s2460_s20, %s3040_s23 }
0x165b   : > { %p2462_p7 = pnand %p2461_p4, %p2607_p5 }
0x165c   : > { %p2467_p11 = por %p2466_p10, %p2465_p9 }
0x165d   : > { %p2463_p8 = pneg %p2462_p7 }
0x165e   : > { %p2469_p13 = por %p2468_p12, %p2467_p11 }
0x1660   : > { %p2470_p0 = pnand %p2469_p13, %p2463_p8 }
0x1662   : > { %2473 = shalt.err (!%p2470_p0)
}
0x1663   : > { %s2522_s22 = smov 128   ;;  %s2523_s24 = smov 256  }
0x1664   : > { %2248 = dma.vmem_to_hbm [thread:$0]  (%p2607_p5), %s3035_s12, 384, %s3040_s23, %s3045_s9, %s2522_s22, %s2523_s24, %s3144_s13  }
0x1665 PF: > { %p2254_p1 = scmp.ge.s32.totalorder %s2508_s30, 2  ;;  %s1803_s0 = sand.u32 1, %s2496_s27  }
0x1666   : > { %s1804_s1 = scalar_lea.sflag [#allocation3], %s1803_s0 }
0x1667   : > { %p2251_p2 = pnand %p2254_p1, %p2611_p6 }
0x1669   : > { %2491 = dma.done.wait (!%p2251_p2), %s1804_s1, 384  }
0x166a   : > { %2493 = vsyncadd (!%p2251_p2), %s1804_s1, 4294966912  ;;  %s3148_s30 = sld [smem:[#allocation6_spill]]  ;;  %s3149_s10 = sld [smem:[#allocation5_spill]] }
0x166b   : > { %s3150_s29 = sld [smem:[#allocation7_spill]]  ;;  %s3151_s27 = smov %s2500_s28 }
0x1670   : > { %p18_p3 = scmp.ge.s32.totalorder %s3148_s30, 4   ;;  %s3152_s28 = smov %s3149_s10 }
0x1672   :  { %20 = sbr.rel (!%p18_p3) target bundleno = 6 (0x6), region = 122 }
0x1679   :  { %1809 = vsyncpa [#allocation3], 1 }
0x167a   :  { %1811 = vsyncpa [#allocation3 + $0x1], 1 }

</bundles_post_ra>
